<compile_context>
chip_gen: v7x
topology: tpu7x:2x2x1
jax: 0.10.0
libtpu: 0.0.40
codegen_flags: <defaults>
</compile_context>

<pallas_src>
from functools import partial

import jax
import jax.numpy as jnp
from jax.experimental import pallas as pl
from jax.experimental.pallas import tpu as pltpu

LANE = 128
SUBLANE = 8
ONEHOT_MAX_VOCAB = 1024  # above this, use the gather path instead of one-hot matmuls


def _round_up(x, m):
    return ((x + m - 1) // m) * m


# ---------------------------------------------------------------------------
# Shared kernel tail:
#   im2col window (tb*S, CW) -> conv matmul -> mask rows t >= L -> max over time
#   -> bias + ReLU (hoisted past the max: exact) -> dropout (identity) -> fc.
# ---------------------------------------------------------------------------
def _conv_pool_fc(win2d, convw_ref, convb_ref, fcw_ref, fcb_ref, out_ref, *, tb, S, L):
    Fp = convw_ref.shape[1]
    conv = jax.lax.dot_general(
        win2d, convw_ref[...],
        dimension_numbers=(((1,), (0,)), ((), ())),
        preferred_element_type=jnp.float32)                       # (tb*S, Fp) f32
    conv = conv.reshape(tb, S, Fp)                                # free: split leading dim
    # Rows t >= L hold wrapped windows -> mask before the time max.
    t_idx = jax.lax.broadcasted_iota(jnp.int32, (tb, S, Fp), 1)
    conv = jnp.where(t_idx < L, conv, -jnp.inf)
    pooled = jnp.max(conv, axis=1)                                # (tb, Fp)
    # Bias + ReLU after the max: exact (bias constant over time, ReLU monotone).
    act = jnp.maximum(pooled + convb_ref[...], 0.0)               # (tb, Fp) f32
    logits = jax.lax.dot_general(
        act.astype(jnp.bfloat16), fcw_ref[...],
        dimension_numbers=(((1,), (0,)), ((), ())),
        preferred_element_type=jnp.float32) + fcb_ref[...]        # (tb, Tp) f32
    out_ref[...] = logits.astype(out_ref.dtype)


def textcnn_onehot_kernel(ids_ref, table_ref, convw_ref, convb_ref, fcw_ref, fcb_ref,
                          out_ref, *, L):
    """Fused embedding lookup (small vocab, one-hot matmul) + conv + pool + fc.

    ids_ref   : (K, tb, S)  int32    K lane-shifted copies of the token ids
    table_ref : (K, Vp, CW) bf16     embedding table placed at lane offset k*E in block k
    convw_ref : (CW, Fp)    bf16     im2col conv weight (contraction padded to 128 lanes)
    convb_ref : (1, Fp)     f32
    fcw_ref   : (Fp, Tp)    bf16
    fcb_ref   : (1, Tp)     f32
    out_ref   : (tb, Tp)    f32
    """
    K, tb, S = ids_ref.shape
    Vp = table_ref.shape[1]

    win = None
    for k in range(K):                                            # static, short loop
        ids_k = ids_ref[k]                                        # (tb, S) i32
        vocab_iota = jax.lax.broadcasted_iota(jnp.int32, (tb, S, Vp), 2)
        onehot = jnp.where(ids_k[:, :, None] == vocab_iota, 1.0, 0.0).astype(jnp.bfloat16)
        part = jax.lax.dot_general(
            onehot.reshape(tb * S, Vp), table_ref[k],
            dimension_numbers=(((1,), (0,)), ((), ())),
            preferred_element_type=jnp.float32)                   # (tb*S, CW) f32
        # Each part only populates its own lane block -> f32 sum is exact.
        win = part if win is None else win + part
    win = win.astype(jnp.bfloat16)                                # exact bf16 table rows
    _conv_pool_fc(win, convw_ref, convb_ref, fcw_ref, fcb_ref, out_ref, tb=tb, S=S, L=L)


def textcnn_win_kernel(win_ref, convw_ref, convb_ref, fcw_ref, fcb_ref, out_ref, *, L):
    """Large-vocab path: the im2col window is pre-gathered in JAX and streamed in."""
    tb, S, CW = win_ref.shape
    win2d = win_ref[...].reshape(tb * S, CW)                      # free: merge leading dims
    _conv_pool_fc(win2d, convw_ref, convb_ref, fcw_ref, fcb_ref, out_ref, tb=tb, S=S, L=L)


def textcnn_forward(token_ids, embed_table, conv_w, conv_b, fc_w, fc_b, kernel_size,
                    *, force_gather=False):
    """token_ids (B, S) int; returns logits (B, tag_size) float32."""
    B, S = token_ids.shape
    V, E = embed_table.shape
    F_ = conv_w.shape[0]
    T = fc_w.shape[0]
    K = kernel_size
    L = S - K + 1
    assert L >= 1, "sequence shorter than the conv kernel"

    Vp = _round_up(V, LANE)
    Fp = _round_up(F_, LANE)
    Tp = _round_up(T, LANE)
    CW = _round_up(K * E, LANE)             # conv contraction padded to full 128-lane vregs

    use_onehot = (V <= ONEHOT_MAX_VOCAB) and not force_gather

    # ---- padded parameters (bf16 MXU operands, f32 biases) -------------------------------
    table_bf = embed_table.astype(jnp.bfloat16)
    w_im2col = conv_w.reshape(F_, K * E).T.astype(jnp.bfloat16)                 # (K*E, F)
    convw_p = jnp.zeros((CW, Fp), jnp.bfloat16).at[:K * E, :F_].set(w_im2col)
    convb_p = jnp.zeros((1, Fp), jnp.float32).at[0, :F_].set(conv_b.astype(jnp.float32))
    fcw_p = jnp.zeros((Fp, Tp), jnp.bfloat16).at[:F_, :T].set(fc_w.T.astype(jnp.bfloat16))
    fcb_p = jnp.zeros((1, Tp), jnp.float32).at[0, :T].set(fc_b.astype(jnp.float32))

    # ---- batch tiling: >=8 sublanes, >=2 grid steps (v7x megacore), tile as large as the
    #      per-tile VMEM transients allow (amortize per-grid-step overhead / fill MXU M) ----
    ids = token_ids.astype(jnp.int32)
    Bp0 = _round_up(B, SUBLANE)
    tb = min(256, max(SUBLANE, _round_up(Bp0 // 2, SUBLANE)))
    if use_onehot:
        per_row_bytes = S * (2 * Vp * 2 + 3 * CW * 4 + Fp * 4)   # one-hots + win/parts + conv
    else:
        per_row_bytes = S * (2 * CW * 2 + CW * 4 + Fp * 4)
    while tb > SUBLANE and tb * per_row_bytes > 8 * 1024 * 1024:
        tb = max(SUBLANE, _round_up(tb // 2, SUBLANE))
    Bp = _round_up(max(Bp0, 2 * tb), tb)
    grid = (Bp // tb,)

    ids_p = jnp.zeros((Bp, S), jnp.int32).at[:B].set(ids)

    if use_onehot:
        # K lane-shifted id copies (window position k); rows with wrapped ids (t >= L) are
        # masked inside the kernel before the time max.
        ids_sh = jnp.stack([jnp.roll(ids_p, -k, axis=1) for k in range(K)], axis=0)
        # Embedding table replicated into the K lane blocks of the im2col window, so each
        # one-hot matmul writes its window slot directly (no in-kernel concat).
        table_blocks = jnp.zeros((K, Vp, CW), jnp.bfloat16)
        for k in range(K):
            table_blocks = table_blocks.at[k, :V, k * E:(k + 1) * E].set(table_bf)

        kernel = partial(textcnn_onehot_kernel, L=L)
        data_inputs = (ids_sh, table_blocks)

        def data_specs_fn(resident):
            return [pl.BlockSpec((K, tb, S), lambda b: (0, b, 0)),
                    resident((K, Vp, CW))]

        flops = 2 * Bp * S * (K * Vp * CW + CW * Fp) + 2 * Bp * Fp * Tp
        bytes_accessed = (K * Bp * S * 4 + K * Vp * CW * 2 + CW * Fp * 2 + Fp * 4
                          + Fp * Tp * 2 + Tp * 4 + Bp * Tp * 4)
        resident_bytes = K * Vp * CW * 2
        in_tile_bytes = K * tb * S * 4
    else:
        # TODO(synk): replace this JAX-side gather with an in-kernel DMA row-gather
        # (scalar-prefetched ids + pltpu.make_async_copy) so the window never hits HBM.
        emb = jnp.take(table_bf, ids_p, axis=0)                              # (Bp, S, E)
        win = jnp.concatenate([jnp.roll(emb, -k, axis=1) for k in range(K)], axis=2)
        win = jnp.pad(win, ((0, 0), (0, 0), (0, CW - K * E)))                # (Bp, S, CW)

        kernel = partial(textcnn_win_kernel, L=L)
        data_inputs = (win,)

        def data_specs_fn(resident):
            return [pl.BlockSpec((tb, S, CW), lambda b: (b, 0, 0))]

        flops = 2 * Bp * S * CW * Fp + 2 * Bp * Fp * Tp
        bytes_accessed = (Bp * S * CW * 2 + CW * Fp * 2 + Fp * 4
                          + Fp * Tp * 2 + Tp * 4 + Bp * Tp * 4)
        resident_bytes = 0
        in_tile_bytes = tb * S * CW * 2

    # ---- VMEM budget derived from actual buffer sizes (cap at 64 MiB for v7x) -------------
    resident_bytes += (convw_p.size * 2 + convb_p.size * 4 + fcw_p.size * 2 + fcb_p.size * 4)
    out_tile_bytes = tb * Tp * 4
    vmem_needed = (2 * resident_bytes                      # worst case: double-buffered
                   + 2 * (in_tile_bytes + out_tile_bytes)
                   + tb * per_row_bytes)
    vmem_limit = int(min(max(2 * vmem_needed, 16 * 1024 * 1024), 64 * 1024 * 1024))

    def run(single_buffer_residents):
        def resident(block_shape):
            idx = lambda b: (0,) * len(block_shape)
            if single_buffer_residents:
                # Grid-invariant operands: single buffer (default double-buffering just
                # doubles their VMEM footprint).
                return pl.BlockSpec(block_shape, idx, pipeline_mode=pl.Buffered(1))
            return pl.BlockSpec(block_shape, idx)

        in_specs = data_specs_fn(resident) + [
            resident((CW, Fp)),
            resident((1, Fp)),
            resident((Fp, Tp)),
            resident((1, Tp)),
        ]
        out = pl.pallas_call(
            kernel,
            out_shape=jax.ShapeDtypeStruct((Bp, Tp), jnp.float32),
            grid_spec=pltpu.PrefetchScalarGridSpec(
                num_scalar_prefetch=0,
                grid=grid,
                in_specs=in_specs,
                out_specs=pl.BlockSpec((tb, Tp), lambda b: (b, 0)),
            ),
            compiler_params=pltpu.CompilerParams(
                dimension_semantics=("parallel",),
                vmem_limit_bytes=vmem_limit,
            ),
            cost_estimate=pl.CostEstimate(
                flops=int(flops), transcendentals=0, bytes_accessed=int(bytes_accessed)),
        )(*data_inputs, convw_p, convb_p, fcw_p, fcb_p)
        return jax.block_until_ready(out)

    try:
        out_p = run(True)
    except Exception:  # pl.Buffered(1) not supported on this JAX build -> default buffering
        out_p = run(False)

    return out_p[:B, :T]


def textcnn_reference(token_ids, embed_table, conv_w, conv_b, fc_w, fc_b, kernel_size):
    """Pure-JAX reference mirroring the PyTorch forward order (relu -> max-pool -> fc),
    with the same bf16 parameter/operand quantization the kernel uses."""
    table = embed_table.astype(jnp.bfloat16).astype(jnp.float32)
    emb = table[token_ids.astype(jnp.int32)]                                  # (B, S, E)
    B, S, E = emb.shape
    K = kernel_size
    L = S - K + 1
    w = conv_w.astype(jnp.bfloat16).astype(jnp.float32)
    conv = sum(jnp.einsum('ble,fe->blf', emb[:, k:k + L, :], w[:, k, :])
               for k in range(K)) + conv_b[None, None, :]                     # (B, L, F)
    conv = jnp.maximum(conv, 0.0)
    pooled = conv.max(axis=1)                                                 # (B, F)
    pooled = pooled.astype(jnp.bfloat16).astype(jnp.float32)
    fw = fc_w.astype(jnp.bfloat16).astype(jnp.float32)
    return pooled @ fw.T + fc_b[None, :]                                      # (B, T)


if __name__ == "__main__":
    # Small, module-consistent shapes.
    vocab_size = 50
    tag_size = 2
    embedding_dim = 32
    num_filters = 8
    kernel_size = 3
    batch = 2
    seq_len = 16

    key = jax.random.PRNGKey(0)
    k_tok, k_emb, k_cw, k_cb, k_fw, k_fb = jax.random.split(key, 6)

    token_ids = jax.random.randint(k_tok, (batch, seq_len), 0, vocab_size, dtype=jnp.int32)
    # "pretrained" embedding table (deterministic, in-script).
    embed_table = jax.random.normal(k_emb, (vocab_size, embedding_dim), jnp.float32) * 0.1
    # Conv2d(1, F, (K, E)) -> weight (F, 1, K, E) squeezed to (F, K, E).
    conv_w = jax.random.normal(k_cw, (num_filters, kernel_size, embedding_dim), jnp.float32) * 0.1
    conv_b = jax.random.normal(k_cb, (num_filters,), jnp.float32) * 0.1
    # Linear(F, T) -> weight (T, F), bias (T,).
    fc_w = jax.random.normal(k_fw, (tag_size, num_filters), jnp.float32) * 0.1
    fc_b = jax.random.normal(k_fb, (tag_size,), jnp.float32) * 0.1

    ref = textcnn_reference(token_ids, embed_table, conv_w, conv_b, fc_w, fc_b, kernel_size)

    # Fused one-hot embedding path (small vocab).
    out = textcnn_forward(token_ids, embed_table, conv_w, conv_b, fc_w, fc_b, kernel_size)
    out = jax.block_until_ready(out)
    if not jnp.allclose(out, ref, atol=1e-3, rtol=1e-3):
        raise AssertionError(f"one-hot path does not match reference:\n{out}\n{ref}")

    # Large-vocab (gather) path, exercised at the same small shapes.
    out_g = textcnn_forward(token_ids, embed_table, conv_w, conv_b, fc_w, fc_b, kernel_size,
                            force_gather=True)
    out_g = jax.block_until_ready(out_g)
    if not jnp.allclose(out_g, ref, atol=1e-3, rtol=1e-3):
        raise AssertionError(f"gather path does not match reference:\n{out_g}\n{ref}")

    print("KERNEL_OK")
</pallas_src>

<mosaic_0001>
module attributes {stable_mosaic.version = 11 : i64} {
  func.func @textcnn_onehot_kernel(%arg0: i32, %arg1: memref<3x8x16xi32, #tpu.memory_space<vmem>>, %arg2: memref<3x128x128xbf16, #tpu.memory_space<vmem>>, %arg3: memref<128x128xbf16, #tpu.memory_space<vmem>>, %arg4: memref<1x128xf32, #tpu.memory_space<vmem>>, %arg5: memref<128x128xbf16, #tpu.memory_space<vmem>>, %arg6: memref<1x128xf32, #tpu.memory_space<vmem>>, %arg7: memref<8x128xf32, #tpu.memory_space<vmem>>) attributes {dimension_semantics = [#tpu.dimension_semantics<parallel>], iteration_bounds = array<i64: 2>, scalar_prefetch = 0 : i64, scratch_operands = 0 : i64, tpu.core_type = #tpu.core_type<tc>, window_params = [{transform_indices = @transform_0, window_bounds = array<i64: 3, 8, 16>}, {pipeline_mode = #tpu.pipeline_mode<synchronous>, transform_indices = @transform_1, window_bounds = array<i64: 3, 128, 128>}, {pipeline_mode = #tpu.pipeline_mode<synchronous>, transform_indices = @transform_2, window_bounds = array<i64: 128, 128>}, {pipeline_mode = #tpu.pipeline_mode<synchronous>, transform_indices = @transform_3, window_bounds = array<i64: 1, 128>}, {pipeline_mode = #tpu.pipeline_mode<synchronous>, transform_indices = @transform_4, window_bounds = array<i64: 128, 128>}, {pipeline_mode = #tpu.pipeline_mode<synchronous>, transform_indices = @transform_5, window_bounds = array<i64: 1, 128>}, {transform_indices = @transform_6, window_bounds = array<i64: 8, 128>}]} {
    %c0 = arith.constant 0 : index
    %c0_0 = arith.constant 0 : index
    %c0_1 = arith.constant 0 : index
    %0 = vector.load %arg1[%c0, %c0_0, %c0_1] : memref<3x8x16xi32, #tpu.memory_space<vmem>>, vector<1x8x16xi32>
    %1 = vector.shape_cast %0 : vector<1x8x16xi32> to vector<8x16xi32>
    %2 = tpu.iota {dimensions = array<i32: 2>} : vector<8x16x128xi32>
    %3 = vector.shape_cast %1 : vector<8x16xi32> to vector<8x16x1xi32>
    %4 = vector.broadcast %3 : vector<8x16x1xi32> to vector<8x16x128xi32>
    %5 = arith.cmpi eq, %4, %2 : vector<8x16x128xi32>
    %cst = arith.constant 1.000000e+00 : f32
    %cst_2 = arith.constant 0.000000e+00 : f32
    %6 = vector.broadcast %cst : f32 to vector<8x16x128xf32>
    %7 = vector.broadcast %cst_2 : f32 to vector<8x16x128xf32>
    %8 = arith.select %5, %6, %7 : vector<8x16x128xi1>, vector<8x16x128xf32>
    %9 = arith.truncf %8 : vector<8x16x128xf32> to vector<8x16x128xbf16>
    %10 = vector.shape_cast %9 : vector<8x16x128xbf16> to vector<128x128xbf16>
    %c0_3 = arith.constant 0 : index
    %c0_4 = arith.constant 0 : index
    %c0_5 = arith.constant 0 : index
    %11 = vector.load %arg2[%c0_3, %c0_4, %c0_5] : memref<3x128x128xbf16, #tpu.memory_space<vmem>>, vector<1x128x128xbf16>
    %12 = vector.shape_cast %11 : vector<1x128x128xbf16> to vector<128x128xbf16>
    %cst_6 = arith.constant dense<0.000000e+00> : vector<128x128xf32>
    %13 = tpu.matmul %10, %12, %cst_6 {dimension_numbers = #tpu.dot_dimension_numbers<[1], [0], [0], [1], [0, 0, 1, 1], [], []>} : vector<128x128xbf16>, vector<128x128xbf16>, vector<128x128xf32> -> vector<128x128xf32>
    %c1 = arith.constant 1 : index
    %c0_7 = arith.constant 0 : index
    %c0_8 = arith.constant 0 : index
    %14 = vector.load %arg1[%c1, %c0_7, %c0_8] : memref<3x8x16xi32, #tpu.memory_space<vmem>>, vector<1x8x16xi32>
    %15 = vector.shape_cast %14 : vector<1x8x16xi32> to vector<8x16xi32>
    %16 = tpu.iota {dimensions = array<i32: 2>} : vector<8x16x128xi32>
    %17 = vector.shape_cast %15 : vector<8x16xi32> to vector<8x16x1xi32>
    %18 = vector.broadcast %17 : vector<8x16x1xi32> to vector<8x16x128xi32>
    %19 = arith.cmpi eq, %18, %16 : vector<8x16x128xi32>
    %cst_9 = arith.constant 1.000000e+00 : f32
    %cst_10 = arith.constant 0.000000e+00 : f32
    %20 = vector.broadcast %cst_9 : f32 to vector<8x16x128xf32>
    %21 = vector.broadcast %cst_10 : f32 to vector<8x16x128xf32>
    %22 = arith.select %19, %20, %21 : vector<8x16x128xi1>, vector<8x16x128xf32>
    %23 = arith.truncf %22 : vector<8x16x128xf32> to vector<8x16x128xbf16>
    %24 = vector.shape_cast %23 : vector<8x16x128xbf16> to vector<128x128xbf16>
    %c1_11 = arith.constant 1 : index
    %c0_12 = arith.constant 0 : index
    %c0_13 = arith.constant 0 : index
    %25 = vector.load %arg2[%c1_11, %c0_12, %c0_13] : memref<3x128x128xbf16, #tpu.memory_space<vmem>>, vector<1x128x128xbf16>
    %26 = vector.shape_cast %25 : vector<1x128x128xbf16> to vector<128x128xbf16>
    %cst_14 = arith.constant dense<0.000000e+00> : vector<128x128xf32>
    %27 = tpu.matmul %24, %26, %cst_14 {dimension_numbers = #tpu.dot_dimension_numbers<[1], [0], [0], [1], [0, 0, 1, 1], [], []>} : vector<128x128xbf16>, vector<128x128xbf16>, vector<128x128xf32> -> vector<128x128xf32>
    %28 = arith.addf %13, %27 : vector<128x128xf32>
    %c2 = arith.constant 2 : index
    %c0_15 = arith.constant 0 : index
    %c0_16 = arith.constant 0 : index
    %29 = vector.load %arg1[%c2, %c0_15, %c0_16] : memref<3x8x16xi32, #tpu.memory_space<vmem>>, vector<1x8x16xi32>
    %30 = vector.shape_cast %29 : vector<1x8x16xi32> to vector<8x16xi32>
    %31 = tpu.iota {dimensions = array<i32: 2>} : vector<8x16x128xi32>
    %32 = vector.shape_cast %30 : vector<8x16xi32> to vector<8x16x1xi32>
    %33 = vector.broadcast %32 : vector<8x16x1xi32> to vector<8x16x128xi32>
    %34 = arith.cmpi eq, %33, %31 : vector<8x16x128xi32>
    %cst_17 = arith.constant 1.000000e+00 : f32
    %cst_18 = arith.constant 0.000000e+00 : f32
    %35 = vector.broadcast %cst_17 : f32 to vector<8x16x128xf32>
    %36 = vector.broadcast %cst_18 : f32 to vector<8x16x128xf32>
    %37 = arith.select %34, %35, %36 : vector<8x16x128xi1>, vector<8x16x128xf32>
    %38 = arith.truncf %37 : vector<8x16x128xf32> to vector<8x16x128xbf16>
    %39 = vector.shape_cast %38 : vector<8x16x128xbf16> to vector<128x128xbf16>
    %c2_19 = arith.constant 2 : index
    %c0_20 = arith.constant 0 : index
    %c0_21 = arith.constant 0 : index
    %40 = vector.load %arg2[%c2_19, %c0_20, %c0_21] : memref<3x128x128xbf16, #tpu.memory_space<vmem>>, vector<1x128x128xbf16>
    %41 = vector.shape_cast %40 : vector<1x128x128xbf16> to vector<128x128xbf16>
    %cst_22 = arith.constant dense<0.000000e+00> : vector<128x128xf32>
    %42 = tpu.matmul %39, %41, %cst_22 {dimension_numbers = #tpu.dot_dimension_numbers<[1], [0], [0], [1], [0, 0, 1, 1], [], []>} : vector<128x128xbf16>, vector<128x128xbf16>, vector<128x128xf32> -> vector<128x128xf32>
    %43 = arith.addf %28, %42 : vector<128x128xf32>
    %44 = arith.truncf %43 : vector<128x128xf32> to vector<128x128xbf16>
    %c0_23 = arith.constant 0 : index
    %c0_24 = arith.constant 0 : index
    %45 = vector.load %arg3[%c0_23, %c0_24] : memref<128x128xbf16, #tpu.memory_space<vmem>>, vector<128x128xbf16>
    %cst_25 = arith.constant dense<0.000000e+00> : vector<128x128xf32>
    %46 = tpu.matmul %44, %45, %cst_25 {dimension_numbers = #tpu.dot_dimension_numbers<[1], [0], [0], [1], [0, 0, 1, 1], [], []>} : vector<128x128xbf16>, vector<128x128xbf16>, vector<128x128xf32> -> vector<128x128xf32>
    %47 = vector.shape_cast %46 : vector<128x128xf32> to vector<8x16x128xf32>
    %48 = tpu.iota {dimensions = array<i32: 1>} : vector<8x16x128xi32>
    %c14_i32 = arith.constant 14 : i32
    %49 = vector.broadcast %c14_i32 : i32 to vector<8x16x128xi32>
    %50 = arith.cmpi slt, %48, %49 : vector<8x16x128xi32>
    %cst_26 = arith.constant 0xFF800000 : f32
    %51 = vector.broadcast %cst_26 : f32 to vector<8x16x128xf32>
    %52 = arith.select %50, %47, %51 : vector<8x16x128xi1>, vector<8x16x128xf32>
    %cst_27 = arith.constant dense<0xFF800000> : vector<8x128xf32>
    %53 = vector.multi_reduction <maximumf>, %52, %cst_27 [1] : vector<8x16x128xf32> to vector<8x128xf32>
    %c0_28 = arith.constant 0 : index
    %c0_29 = arith.constant 0 : index
    %54 = vector.load %arg4[%c0_28, %c0_29] : memref<1x128xf32, #tpu.memory_space<vmem>>, vector<1x128xf32>
    %55 = vector.broadcast %54 : vector<1x128xf32> to vector<8x128xf32>
    %56 = arith.addf %53, %55 : vector<8x128xf32>
    %cst_30 = arith.constant 0.000000e+00 : f32
    %57 = vector.broadcast %cst_30 : f32 to vector<8x128xf32>
    %58 = arith.maximumf %56, %57 : vector<8x128xf32>
    %59 = arith.truncf %58 : vector<8x128xf32> to vector<8x128xbf16>
    %c0_31 = arith.constant 0 : index
    %c0_32 = arith.constant 0 : index
    %60 = vector.load %arg5[%c0_31, %c0_32] : memref<128x128xbf16, #tpu.memory_space<vmem>>, vector<128x128xbf16>
    %cst_33 = arith.constant dense<0.000000e+00> : vector<8x128xf32>
    %61 = tpu.matmul %59, %60, %cst_33 {dimension_numbers = #tpu.dot_dimension_numbers<[1], [0], [0], [1], [0, 0, 1, 1], [], []>} : vector<8x128xbf16>, vector<128x128xbf16>, vector<8x128xf32> -> vector<8x128xf32>
    %c0_34 = arith.constant 0 : index
    %c0_35 = arith.constant 0 : index
    %62 = vector.load %arg6[%c0_34, %c0_35] : memref<1x128xf32, #tpu.memory_space<vmem>>, vector<1x128xf32>
    %63 = vector.broadcast %62 : vector<1x128xf32> to vector<8x128xf32>
    %64 = arith.addf %61, %63 : vector<8x128xf32>
    %c0_36 = arith.constant 0 : index
    %c0_37 = arith.constant 0 : index
    %65 = vector.load %arg7[%c0_36, %c0_37] : memref<8x128xf32, #tpu.memory_space<vmem>>, vector<8x128xf32>
    tpu.vector_store %arg7[%c0_36, %c0_37], %64 {strides = array<i32>} : memref<8x128xf32, #tpu.memory_space<vmem>>, vector<8x128xf32>,
    return
  }
  func.func @transform_0(%arg0: i32) -> (i32, i32, i32) {
    %c0_i32 = arith.constant 0 : i32
    %c0_i32_0 = arith.constant 0 : i32
    %c0_i32_1 = arith.constant 0 : i32
    return %c0_i32, %arg0, %c0_i32_0 : i32, i32, i32
  }
  func.func @transform_1(%arg0: i32) -> (i32, i32, i32) {
    %c0_i32 = arith.constant 0 : i32
    %c0_i32_0 = arith.constant 0 : i32
    %c0_i32_1 = arith.constant 0 : i32
    %c0_i32_2 = arith.constant 0 : i32
    return %c0_i32, %c0_i32_0, %c0_i32_1 : i32, i32, i32
  }
  func.func @transform_2(%arg0: i32) -> (i32, i32) {
    %c0_i32 = arith.constant 0 : i32
    %c0_i32_0 = arith.constant 0 : i32
    %c0_i32_1 = arith.constant 0 : i32
    return %c0_i32, %c0_i32_0 : i32, i32
  }
  func.func @transform_3(%arg0: i32) -> (i32, i32) {
    %c0_i32 = arith.constant 0 : i32
    %c0_i32_0 = arith.constant 0 : i32
    %c0_i32_1 = arith.constant 0 : i32
    return %c0_i32, %c0_i32_0 : i32, i32
  }
  func.func @transform_4(%arg0: i32) -> (i32, i32) {
    %c0_i32 = arith.constant 0 : i32
    %c0_i32_0 = arith.constant 0 : i32
    %c0_i32_1 = arith.constant 0 : i32
    return %c0_i32, %c0_i32_0 : i32, i32
  }
  func.func @transform_5(%arg0: i32) -> (i32, i32) {
    %c0_i32 = arith.constant 0 : i32
    %c0_i32_0 = arith.constant 0 : i32
    %c0_i32_1 = arith.constant 0 : i32
    return %c0_i32, %c0_i32_0 : i32, i32
  }
  func.func @transform_6(%arg0: i32) -> (i32, i32) {
    %c0_i32 = arith.constant 0 : i32
    %c0_i32_0 = arith.constant 0 : i32
    return %arg0, %c0_i32 : i32, i32
  }
}

module attributes {stable_mosaic.version = 11 : i64} {
  func.func @textcnn_onehot_kernel(%arg0: i32, %arg1: memref<3x8x16xi32, #tpu.memory_space<vmem>>, %arg2: memref<3x128x128xbf16, #tpu.memory_space<vmem>>, %arg3: memref<128x128xbf16, #tpu.memory_space<vmem>>, %arg4: memref<1x128xf32, #tpu.memory_space<vmem>>, %arg5: memref<128x128xbf16, #tpu.memory_space<vmem>>, %arg6: memref<1x128xf32, #tpu.memory_space<vmem>>, %arg7: memref<8x128xf32, #tpu.memory_space<vmem>>) attributes {dimension_semantics = [#tpu.dimension_semantics<parallel>], iteration_bounds = array<i64: 2>, scalar_prefetch = 0 : i64, scratch_operands = 0 : i64, tpu.core_type = #tpu.core_type<tc>, window_params = [{transform_indices = @transform_0, window_bounds = array<i64: 3, 8, 16>}, {pipeline_mode = #tpu.pipeline_mode<synchronous>, transform_indices = @transform_1, window_bounds = array<i64: 3, 128, 128>}, {pipeline_mode = #tpu.pipeline_mode<synchronous>, transform_indices = @transform_2, window_bounds = array<i64: 128, 128>}, {pipeline_mode = #tpu.pipeline_mode<synchronous>, transform_indices = @transform_3, window_bounds = array<i64: 1, 128>}, {pipeline_mode = #tpu.pipeline_mode<synchronous>, transform_indices = @transform_4, window_bounds = array<i64: 128, 128>}, {pipeline_mode = #tpu.pipeline_mode<synchronous>, transform_indices = @transform_5, window_bounds = array<i64: 1, 128>}, {transform_indices = @transform_6, window_bounds = array<i64: 8, 128>}]} {
    %c0 = arith.constant 0 : index
    %c0_0 = arith.constant 0 : index
    %c0_1 = arith.constant 0 : index
    %0 = vector.load %arg1[%c0, %c0_0, %c0_1] : memref<3x8x16xi32, #tpu.memory_space<vmem>>, vector<1x8x16xi32>
    %1 = vector.shape_cast %0 : vector<1x8x16xi32> to vector<8x16xi32>
    %2 = tpu.iota {dimensions = array<i32: 2>} : vector<8x16x128xi32>
    %3 = vector.shape_cast %1 : vector<8x16xi32> to vector<8x16x1xi32>
    %4 = vector.broadcast %3 : vector<8x16x1xi32> to vector<8x16x128xi32>
    %5 = arith.cmpi eq, %4, %2 : vector<8x16x128xi32>
    %cst = arith.constant 1.000000e+00 : f32
    %cst_2 = arith.constant 0.000000e+00 : f32
    %6 = vector.broadcast %cst : f32 to vector<8x16x128xf32>
    %7 = vector.broadcast %cst_2 : f32 to vector<8x16x128xf32>
    %8 = arith.select %5, %6, %7 : vector<8x16x128xi1>, vector<8x16x128xf32>
    %9 = arith.truncf %8 : vector<8x16x128xf32> to vector<8x16x128xbf16>
    %10 = vector.shape_cast %9 : vector<8x16x128xbf16> to vector<128x128xbf16>
    %c0_3 = arith.constant 0 : index
    %c0_4 = arith.constant 0 : index
    %c0_5 = arith.constant 0 : index
    %11 = vector.load %arg2[%c0_3, %c0_4, %c0_5] : memref<3x128x128xbf16, #tpu.memory_space<vmem>>, vector<1x128x128xbf16>
    %12 = vector.shape_cast %11 : vector<1x128x128xbf16> to vector<128x128xbf16>
    %cst_6 = arith.constant dense<0.000000e+00> : vector<128x128xf32>
    %13 = tpu.matmul %10, %12, %cst_6 {dimension_numbers = #tpu.dot_dimension_numbers<[1], [0], [0], [1], [0, 0, 1, 1], [], []>} : vector<128x128xbf16>, vector<128x128xbf16>, vector<128x128xf32> -> vector<128x128xf32>
    %c1 = arith.constant 1 : index
    %c0_7 = arith.constant 0 : index
    %c0_8 = arith.constant 0 : index
    %14 = vector.load %arg1[%c1, %c0_7, %c0_8] : memref<3x8x16xi32, #tpu.memory_space<vmem>>, vector<1x8x16xi32>
    %15 = vector.shape_cast %14 : vector<1x8x16xi32> to vector<8x16xi32>
    %16 = tpu.iota {dimensions = array<i32: 2>} : vector<8x16x128xi32>
    %17 = vector.shape_cast %15 : vector<8x16xi32> to vector<8x16x1xi32>
    %18 = vector.broadcast %17 : vector<8x16x1xi32> to vector<8x16x128xi32>
    %19 = arith.cmpi eq, %18, %16 : vector<8x16x128xi32>
    %cst_9 = arith.constant 1.000000e+00 : f32
    %cst_10 = arith.constant 0.000000e+00 : f32
    %20 = vector.broadcast %cst_9 : f32 to vector<8x16x128xf32>
    %21 = vector.broadcast %cst_10 : f32 to vector<8x16x128xf32>
    %22 = arith.select %19, %20, %21 : vector<8x16x128xi1>, vector<8x16x128xf32>
    %23 = arith.truncf %22 : vector<8x16x128xf32> to vector<8x16x128xbf16>
    %24 = vector.shape_cast %23 : vector<8x16x128xbf16> to vector<128x128xbf16>
    %c1_11 = arith.constant 1 : index
    %c0_12 = arith.constant 0 : index
    %c0_13 = arith.constant 0 : index
    %25 = vector.load %arg2[%c1_11, %c0_12, %c0_13] : memref<3x128x128xbf16, #tpu.memory_space<vmem>>, vector<1x128x128xbf16>
    %26 = vector.shape_cast %25 : vector<1x128x128xbf16> to vector<128x128xbf16>
    %cst_14 = arith.constant dense<0.000000e+00> : vector<128x128xf32>
    %27 = tpu.matmul %24, %26, %cst_14 {dimension_numbers = #tpu.dot_dimension_numbers<[1], [0], [0], [1], [0, 0, 1, 1], [], []>} : vector<128x128xbf16>, vector<128x128xbf16>, vector<128x128xf32> -> vector<128x128xf32>
    %28 = arith.addf %13, %27 : vector<128x128xf32>
    %c2 = arith.constant 2 : index
    %c0_15 = arith.constant 0 : index
    %c0_16 = arith.constant 0 : index
    %29 = vector.load %arg1[%c2, %c0_15, %c0_16] : memref<3x8x16xi32, #tpu.memory_space<vmem>>, vector<1x8x16xi32>
    %30 = vector.shape_cast %29 : vector<1x8x16xi32> to vector<8x16xi32>
    %31 = tpu.iota {dimensions = array<i32: 2>} : vector<8x16x128xi32>
    %32 = vector.shape_cast %30 : vector<8x16xi32> to vector<8x16x1xi32>
    %33 = vector.broadcast %32 : vector<8x16x1xi32> to vector<8x16x128xi32>
    %34 = arith.cmpi eq, %33, %31 : vector<8x16x128xi32>
    %cst_17 = arith.constant 1.000000e+00 : f32
    %cst_18 = arith.constant 0.000000e+00 : f32
    %35 = vector.broadcast %cst_17 : f32 to vector<8x16x128xf32>
    %36 = vector.broadcast %cst_18 : f32 to vector<8x16x128xf32>
    %37 = arith.select %34, %35, %36 : vector<8x16x128xi1>, vector<8x16x128xf32>
    %38 = arith.truncf %37 : vector<8x16x128xf32> to vector<8x16x128xbf16>
    %39 = vector.shape_cast %38 : vector<8x16x128xbf16> to vector<128x128xbf16>
    %c2_19 = arith.constant 2 : index
    %c0_20 = arith.constant 0 : index
    %c0_21 = arith.constant 0 : index
    %40 = vector.load %arg2[%c2_19, %c0_20, %c0_21] : memref<3x128x128xbf16, #tpu.memory_space<vmem>>, vector<1x128x128xbf16>
    %41 = vector.shape_cast %40 : vector<1x128x128xbf16> to vector<128x128xbf16>
    %cst_22 = arith.constant dense<0.000000e+00> : vector<128x128xf32>
    %42 = tpu.matmul %39, %41, %cst_22 {dimension_numbers = #tpu.dot_dimension_numbers<[1], [0], [0], [1], [0, 0, 1, 1], [], []>} : vector<128x128xbf16>, vector<128x128xbf16>, vector<128x128xf32> -> vector<128x128xf32>
    %43 = arith.addf %28, %42 : vector<128x128xf32>
    %44 = arith.truncf %43 : vector<128x128xf32> to vector<128x128xbf16>
    %c0_23 = arith.constant 0 : index
    %c0_24 = arith.constant 0 : index
    %45 = vector.load %arg3[%c0_23, %c0_24] : memref<128x128xbf16, #tpu.memory_space<vmem>>, vector<128x128xbf16>
    %cst_25 = arith.constant dense<0.000000e+00> : vector<128x128xf32>
    %46 = tpu.matmul %44, %45, %cst_25 {dimension_numbers = #tpu.dot_dimension_numbers<[1], [0], [0], [1], [0, 0, 1, 1], [], []>} : vector<128x128xbf16>, vector<128x128xbf16>, vector<128x128xf32> -> vector<128x128xf32>
    %47 = vector.shape_cast %46 : vector<128x128xf32> to vector<8x16x128xf32>
    %48 = tpu.iota {dimensions = array<i32: 1>} : vector<8x16x128xi32>
    %c14_i32 = arith.constant 14 : i32
    %49 = vector.broadcast %c14_i32 : i32 to vector<8x16x128xi32>
    %50 = arith.cmpi slt, %48, %49 : vector<8x16x128xi32>
    %cst_26 = arith.constant 0xFF800000 : f32
    %51 = vector.broadcast %cst_26 : f32 to vector<8x16x128xf32>
    %52 = arith.select %50, %47, %51 : vector<8x16x128xi1>, vector<8x16x128xf32>
    %cst_27 = arith.constant dense<0xFF800000> : vector<8x128xf32>
    %53 = vector.multi_reduction <maximumf>, %52, %cst_27 [1] : vector<8x16x128xf32> to vector<8x128xf32>
    %c0_28 = arith.constant 0 : index
    %c0_29 = arith.constant 0 : index
    %54 = vector.load %arg4[%c0_28, %c0_29] : memref<1x128xf32, #tpu.memory_space<vmem>>, vector<1x128xf32>
    %55 = vector.broadcast %54 : vector<1x128xf32> to vector<8x128xf32>
    %56 = arith.addf %53, %55 : vector<8x128xf32>
    %cst_30 = arith.constant 0.000000e+00 : f32
    %57 = vector.broadcast %cst_30 : f32 to vector<8x128xf32>
    %58 = arith.maximumf %56, %57 : vector<8x128xf32>
    %59 = arith.truncf %58 : vector<8x128xf32> to vector<8x128xbf16>
    %c0_31 = arith.constant 0 : index
    %c0_32 = arith.constant 0 : index
    %60 = vector.load %arg5[%c0_31, %c0_32] : memref<128x128xbf16, #tpu.memory_space<vmem>>, vector<128x128xbf16>
    %cst_33 = arith.constant dense<0.000000e+00> : vector<8x128xf32>
    %61 = tpu.matmul %59, %60, %cst_33 {dimension_numbers = #tpu.dot_dimension_numbers<[1], [0], [0], [1], [0, 0, 1, 1], [], []>} : vector<8x128xbf16>, vector<128x128xbf16>, vector<8x128xf32> -> vector<8x128xf32>
    %c0_34 = arith.constant 0 : index
    %c0_35 = arith.constant 0 : index
    %62 = vector.load %arg6[%c0_34, %c0_35] : memref<1x128xf32, #tpu.memory_space<vmem>>, vector<1x128xf32>
    %63 = vector.broadcast %62 : vector<1x128xf32> to vector<8x128xf32>
    %64 = arith.addf %61, %63 : vector<8x128xf32>
    %c0_36 = arith.constant 0 : index
    %c0_37 = arith.constant 0 : index
    %65 = vector.load %arg7[%c0_36, %c0_37] : memref<8x128xf32, #tpu.memory_space<vmem>>, vector<8x128xf32>
    tpu.vector_store %arg7[%c0_36, %c0_37], %64 {strides = array<i32>} : memref<8x128xf32, #tpu.memory_space<vmem>>, vector<8x128xf32>,
    return
  }
  func.func @transform_0(%arg0: i32) -> (i32, i32, i32) {
    %c0_i32 = arith.constant 0 : i32
    %c0_i32_0 = arith.constant 0 : i32
    %c0_i32_1 = arith.constant 0 : i32
    return %c0_i32, %arg0, %c0_i32_0 : i32, i32, i32
  }
  func.func @transform_1(%arg0: i32) -> (i32, i32, i32) {
    %c0_i32 = arith.constant 0 : i32
    %c0_i32_0 = arith.constant 0 : i32
    %c0_i32_1 = arith.constant 0 : i32
    %c0_i32_2 = arith.constant 0 : i32
    return %c0_i32, %c0_i32_0, %c0_i32_1 : i32, i32, i32
  }
  func.func @transform_2(%arg0: i32) -> (i32, i32) {
    %c0_i32 = arith.constant 0 : i32
    %c0_i32_0 = arith.constant 0 : i32
    %c0_i32_1 = arith.constant 0 : i32
    return %c0_i32, %c0_i32_0 : i32, i32
  }
  func.func @transform_3(%arg0: i32) -> (i32, i32) {
    %c0_i32 = arith.constant 0 : i32
    %c0_i32_0 = arith.constant 0 : i32
    %c0_i32_1 = arith.constant 0 : i32
    return %c0_i32, %c0_i32_0 : i32, i32
  }
  func.func @transform_4(%arg0: i32) -> (i32, i32) {
    %c0_i32 = arith.constant 0 : i32
    %c0_i32_0 = arith.constant 0 : i32
    %c0_i32_1 = arith.constant 0 : i32
    return %c0_i32, %c0_i32_0 : i32, i32
  }
  func.func @transform_5(%arg0: i32) -> (i32, i32) {
    %c0_i32 = arith.constant 0 : i32
    %c0_i32_0 = arith.constant 0 : i32
    %c0_i32_1 = arith.constant 0 : i32
    return %c0_i32, %c0_i32_0 : i32, i32
  }
  func.func @transform_6(%arg0: i32) -> (i32, i32) {
    %c0_i32 = arith.constant 0 : i32
    %c0_i32_0 = arith.constant 0 : i32
    return %arg0, %c0_i32 : i32, i32
  }
}

</mosaic_0001>

<bundles_post_ra>
// kernel: tpu_custom_call.1
= control target key start
LH: loop header
LB: loop body
LE: loop exit
PB: predicated region body
PF: predicated region fallthrough
CT: control target
= control target key end

     0   :  { %s2914_s0 = inlined_call_operand.hbm [shape: s32[3,16,16], index: 0, kind: input, shape index: {}]   ;;  %s2915_s1 = inlined_call_operand.hbm [shape: bf16[3,128,128], index: 1, kind: input, shape index: {}]   ;;  %s2916_s2 = inlined_call_operand.hbm [shape: bf16[128,128], index: 2, kind: input, shape index: {}]   ;;  %s2917_s3 = inlined_call_operand.vmem [shape: f32[1,128], index: 3, kind: input, shape index: {}]   ;;  %s2918_s4 = inlined_call_operand.hbm [shape: bf16[128,128], index: 4, kind: input, shape index: {}]   ;;  %s2919_s5 = inlined_call_operand.vmem [shape: f32[1,128], index: 5, kind: input, shape index: {}]   ;;  %s2920_s6 = inlined_call_operand.hbm [shape: f32[16,128], index: 6, kind: output, shape index: {}]  }
   0x1   :  { %2929 = sst [smem:[#allocation18_spill]] %s2915_s1 }
   0x2   :  { %11 = vsyncpa [#allocation3], 0 }
   0x3   :  { %13 = vsyncpa [#allocation3 + $0x1], 0 }
   0x4   :  { %14 = vsyncpa [#allocation6], 0 }
   0x5   :  { %15 = vsyncpa [#allocation9], 0 }
   0x6   :  { %16 = vsyncpa [#allocation4], 0 }
   0x7   :  { %18 = vsyncpa [#allocation4 + $0x1], 0  ;;  %s2473_s21 = smov 0   ;;  %s2475_s22 = smov 0  }
   0x8   :  { %s2477_s23 = smov 0   ;;  %s2479_s24 = smov 0  }
   0x9 LB: > { %s2494_s25 = sadd.s32 4294967295, %s2423_s24   ;;  %s1747_s26 = sadd.s32 4294967294, %s2423_s24   ;;  %s2423_s24 = sphi %s2479_s24, %s2955_s24   ;;  %s2419_s23 = sphi %s2477_s23, %s2959_s23   ;;  %s2415_s22 = sphi %s2475_s22, %s2958_s22   ;;  %s2411_s21 = sphi %s2473_s21, %s2957_s21  }
   0xa   : > { %s2498_s27 = sadd.s32 1, %s2423_s24   ;;  %s31_s28 = sadd.s32 1, %s2419_s23 }
   0xb   : > { %2930 = sst [smem:[#allocation15_spill]] %s2498_s27  ;;  %s28_s29 = ssub.s32 %s2423_s24, %s2498_s27 }
   0xc   : > { %p38_p0 = scmp.ne.s32.totalorder %s2419_s23, %s2415_s22  ;;  %p29_p1 = scmp.eq.s32.totalorder %s28_s29, 0 }
   0xd   : > { %p39_p2 = scmp.eq.s32.totalorder %s2423_s24, 0  ;;  %p44_p3 = scmp.ne.s32.totalorder %s2415_s22, %s2411_s21 }
   0xe   : > { %p2921_p4 = scmp.eq.s32.totalorder %s2494_s25, 0  ;;  %p173_p7 = scmp.eq.s32.totalorder %s2494_s25, 1 }
   0xf   : > { %s2510_s30 = scalar_select %p29_p1, %s2419_s23, %s31_s28  }
  0x10   : > { %p2512_p5 = por %p39_p2, %p38_p0  ;;  %p2518_p6 = por %p2921_p4, %p44_p3 }
  0x11   : > { %2931 = sst [smem:[#allocation16_spill]] %s2510_s30  ;;  %p179_p8 = scmp.eq.s32.totalorder %s1747_s26, 1 }
  0x12   : > { %s2932_s7 = scalar_select %p2512_p5, 1, 0 }
  0x13   : > { %s2933_s8 = scalar_select %p2518_p6, 1, 0 }
  0x14   : > { %p1748_p9 = scmp.ge.s32.totalorder %s2423_s24, 1  ;;  %p186_p10 = scmp.lt.s32.totalorder %s2423_s24, 3 }
  0x15   : > { %p2525_p11 = por %p173_p7, %p38_p0  ;;  %p2529_p12 = por %p179_p8, %p44_p3 }
  0x16   : > { %p2533_p13 = pnand %p1748_p9, %p186_p10  ;;  %s2425_s12 = smov [#allocation5]  }
  0x17   : > { %s2934_s9 = scalar_select %p2525_p11, 1, 0 }
  0x18   : > { %s2935_s10 = scalar_select %p2529_p12, 1, 0 }
  0x19   : > { %s2937_s11 = scalar_select %p2533_p13, 1, 0 }
  0x1a   : > { %2936 = sst [smem:[#allocation17_spill]] %s2935_s10  ;;  %p2126_p1 = pneg %p2533_p13 }
  0x1b   : > { %s198_s13 = sshll.u32 %s2425_s12, 4  ;;  %s2426_s15 = smov [#allocation7]   ;;  %s199_s13 = int_to_ptr.vmem [resolvable:$true] %s198_s13 }
  0x1c   : > { %p2541_p2 = pnand %p2126_p1, %p2921_p4  ;;  %s211_s16 = sshll.u32 %s2426_s15, 4  ;;  %s212_s16 = int_to_ptr.vmem [resolvable:$true] %s211_s16 }
  0x1d   : > { %s2939_s1 = sld [smem:[#allocation18_spill]] }
  0x1e   : > { %p2555_p8 = pneg %p2541_p2 }
  0x23   : > { %s2235_s19 = scalar_lea.hbm %s2939_s1, 3072 }
  0x24   : > { %p2236_p7 = scmp.ne.s32.totalorder %s2939_s1, %s2235_s19  ;;  %p2242_p1 = scmp.lt.u32.totalorder %s2235_s19, %s2939_s1 }
  0x26   : > { %p2238_p9 = pnand %p2555_p8, %p2236_p7 }
  0x28   : > { %p2239_p10 = pneg %p2238_p9 }
  0x2a   : > { %p2244_p0 = pnand %p2242_p1, %p2239_p10 }
  0x2c   : > { %2247 = shalt.err (!%p2244_p0)
}
  0x2d   : > { %s2248_s15 = scalar_lea.vmem %s199_s13, 3072  ;;  %p2256_p11 = scmp.lt.s32.totalorder %s199_s13, %s199_s13 }
  0x2e   : > { %p2249_p4 = scmp.ne.s32.totalorder %s199_s13, %s2248_s15  ;;  %p2257_p6 = scmp.lt.s32.totalorder %s2248_s15, %s2248_s15 }
  0x30   : > { %p2251_p3 = pnand %p2249_p4, %p2555_p8  ;;  %p2258_p13 = por %p2257_p6, %p2256_p11 }
  0x32   : > { %p2252_p12 = pneg %p2251_p3 }
  0x34   : > { %p2259_p5 = pnand %p2258_p13, %p2252_p12 }
  0x36   : > { %2262 = shalt.err (!%p2259_p5)
}
  0x37   : > { %s2427_s17 = smov 64   ;;  %s2428_s18 = smov 4  }
  0x38   : > { %2129 = dma.hbm_to_vmem [thread:$0]  (!%p2541_p2), %s2939_s1, 3072, %s199_s13, [#allocation6], %s2427_s17, %s2427_s17, %s2428_s18  }
  0x39   : > { %p2941_p4 = scmp.ne.s32.totalorder %s2932_s7, 0  ;;  %p2942_p0 = scmp.lt.s32.totalorder %s2423_s24, 2 }
  0x3a   : > { %s2263_s15 = scalar_lea.hbm %s2916_s2, 1024 }
  0x3b   : > { %p2578_p3 = pnand %p2942_p0, %p2941_p4  ;;  %p2264_p5 = scmp.ne.s32.totalorder %s2916_s2, %s2263_s15 }
  0x3c   : > { %p2270_p12 = scmp.lt.u32.totalorder %s2263_s15, %s2916_s2 }
  0x3d   : > { %s2943_s26 = scalar_select %p2578_p3, 1, 0 }
  0x3e   : > { %p2266_p6 = pnand %p2264_p5, %p2555_p8 }
  0x40   : > { %p2267_p11 = pneg %p2266_p6 }
  0x42   : > { %p2272_p13 = pnand %p2270_p12, %p2267_p11 }
  0x44   : > { %2275 = shalt.err (!%p2272_p13)
}
  0x45   : > { %s2276_s7 = scalar_lea.vmem %s212_s16, 1024  ;;  %p2284_p1 = scmp.lt.s32.totalorder %s212_s16, %s212_s16 }
  0x46   : > { %p2277_p7 = scmp.ne.s32.totalorder %s212_s16, %s2276_s7  ;;  %p2285_p4 = scmp.lt.s32.totalorder %s2276_s7, %s2276_s7 }
  0x48   : > { %p2279_p9 = pnand %p2277_p7, %p2555_p8  ;;  %p2286_p0 = por %p2285_p4, %p2284_p1 }
  0x4a   : > { %p2280_p10 = pneg %p2279_p9 }
  0x4c   : > { %p2287_p3 = pnand %p2286_p0, %p2280_p10 }
  0x4e   : > { %2290 = shalt.err (!%p2287_p3)
}
  0x4f   : > { %2132 = dma.hbm_to_vmem [thread:$0]  (!%p2541_p2), %s2916_s2, 1024, %s212_s16, [#allocation6], %s2427_s17, %s2427_s17, %s2428_s18  }
  0x50   : > { %s2429_s20 = smov [#allocation8]   ;;  %s244_s12 = sand.u32 1, %s2419_s23  }
  0x51   : > { %s227_s29 = sshll.u32 %s2429_s20, 4  ;;  %s2291_s13 = scalar_lea.hbm %s2918_s4, 1024  ;;  %s228_s29 = int_to_ptr.vmem [resolvable:$true] %s227_s29 }
  0x52   : > { %p2292_p3 = scmp.ne.s32.totalorder %s2918_s4, %s2291_s13  ;;  %p2298_p11 = scmp.lt.u32.totalorder %s2291_s13, %s2918_s4 }
  0x54   : > { %p2294_p5 = pnand %p2292_p3, %p2555_p8 }
  0x56   : > { %p2295_p6 = pneg %p2294_p5 }
  0x58   : > { %p2300_p12 = pnand %p2298_p11, %p2295_p6 }
  0x5a   : > { %2303 = shalt.err (!%p2300_p12)
}
  0x5b   : > { %s2304_s16 = scalar_lea.vmem %s228_s29, 1024  ;;  %p2312_p10 = scmp.lt.s32.totalorder %s228_s29, %s228_s29 }
  0x5c   : > { %p2305_p13 = scmp.ne.s32.totalorder %s228_s29, %s2304_s16  ;;  %p2313_p1 = scmp.lt.s32.totalorder %s2304_s16, %s2304_s16 }
  0x5e   : > { %p2307_p7 = pnand %p2305_p13, %p2555_p8  ;;  %p2314_p4 = por %p2313_p1, %p2312_p10 }
  0x60   : > { %p2308_p9 = pneg %p2307_p7 }
  0x62   : > { %p2315_p0 = pnand %p2314_p4, %p2308_p9 }
  0x64   : > { %2318 = shalt.err (!%p2315_p0)
}
  0x65   : > { %2135 = dma.hbm_to_vmem [thread:$0]  (!%p2541_p2), %s2918_s4, 1024, %s228_s29, [#allocation9], %s2427_s17, %s2427_s17, %s2428_s18  }
  0x66   : > { %s2108_s28 = smul.u32 24, %s244_s12  ;;  %s1753_s30 = sshll.u32 %s2423_s24, 7 }
  0x67   : > { %s2629_s19 = scalar_lea.hbm %s2914_s0, %s1753_s30  ;;  %s2633_s7 = scalar_lea.sflag [#allocation3], %s244_s12 }
  0x68   : > { %s248_s14 = scalar_lea.vmem [#allocation2], %s2108_s28  ;;  %s2319_s27 = scalar_lea.hbm %s2629_s19, 384 }
  0x69   : > { %s254_s13 = sshll.u32 %s248_s14, 4  ;;  %p2320_p8 = scmp.ne.s32.totalorder %s2629_s19, %s2319_s27  ;;  %s2631_s13 = int_to_ptr.vmem [resolvable:$true] %s254_s13 }
  0x6a   : > { %p2944_p2 = scmp.ne.s32.totalorder %s2943_s26, 0  ;;  %s2324_s29 = scalar_lea.hbm %s2914_s0, 768 }
  0x6b   : > { %p2325_p11 = scmp.lt.u32.totalorder %s2629_s19, %s2914_s0  ;;  %p2326_p12 = scmp.lt.u32.totalorder %s2324_s29, %s2319_s27 }
  0x6c   : > { %p2321_p3 = pneg %p2944_p2  ;;  %p2328_p7 = scmp.lt.u32.totalorder %s2319_s27, %s2629_s19 }
  0x6d   : > { %p2327_p13 = por %p2326_p12, %p2325_p11 }
  0x6e   : > { %p2322_p5 = pnand %p2321_p3, %p2320_p8 }
  0x6f   : > { %p2329_p9 = por %p2328_p7, %p2327_p13 }
  0x70   : > { %p2323_p6 = pneg %p2322_p5 }
  0x72   : > { %p2330_p10 = pnand %p2329_p9, %p2323_p6 }
  0x74   : > { %2333 = shalt.err (!%p2330_p10)
}
  0x75   : > { %s2334_s12 = scalar_lea.vmem %s2631_s13, 384  ;;  %s2430_s10 = smov [#allocation2]  }
  0x76   : > { %p2335_p1 = scmp.ne.s32.totalorder %s2631_s13, %s2334_s12  ;;  %s2339_s28 = sshll.u32 %s2430_s10, 4  ;;  %s2340_s28 = int_to_ptr.vmem [resolvable:$false] %s2339_s28 }
  0x77   : > { %s2341_s30 = scalar_lea.vmem %s2340_s28, 768  ;;  %p2342_p8 = scmp.lt.s32.totalorder %s2631_s13, %s2340_s28 }
  0x78   : > { %p2337_p4 = pnand %p2335_p1, %p2321_p3  ;;  %p2343_p5 = scmp.lt.s32.totalorder %s2341_s30, %s2334_s12 }
  0x7a   : > { %p2338_p0 = pneg %p2337_p4  ;;  %p2344_p11 = por %p2343_p5, %p2342_p8 }
  0x7c   : > { %p2345_p12 = pnand %p2344_p11, %p2338_p0 }
  0x7e   : > { %2348 = shalt.err (!%p2345_p12)
}
  0x7f   : > { %s2431_s20 = smov 256   ;;  %s2432_s15 = smov 128  }
  0x80   : > { %s2433_s14 = smov 8   ;;  %p2945_p3 = scmp.ne.s32.totalorder %s2937_s11, 0 }
  0x81   : > { %2139 = dma.hbm_to_vmem [thread:$0]  (!%p2944_p2), %s2629_s19, 384, %s2631_s13, %s2633_s7, %s2431_s20, %s2432_s15, %s2433_s14  }
  0x82   : > { %266 = sbr.rel (%p2945_p3) target bundleno = 1053 (0x41d), region = 44  ;;  %s2664_s27 = sand.u32 (!%p2945_p3), 1, %s2415_s22  }
  0x83   : > { %s2109_s17 = smul.u32 (!%p2945_p3), 24, %s2664_s27  ;;  %s269_s18 = scalar_lea.sflag (!%p2945_p3), [#allocation3], %s2664_s27 }
  0x84   : > { %p2946_p6 = scmp.ne.s32.totalorder (!%p2945_p3), %s2933_s8, 0 }
  0x85   : > { %s2668_s29 = scalar_lea.vmem (!%p2945_p3), [#allocation2], %s2109_s17 }
  0x89   : > { %2394 = dma.done.wait (%p2946_p6), %s269_s18, 384  }
  0x8a   : > { %2396 = vsyncadd (%p2946_p6), %s269_s18, 4294966912  ;;  %p2947_p2 = scmp.eq.s32.totalorder %s2494_s25, 0 }
  0x8c   : > { %2398 = dma.done.wait (%p2947_p2), [#allocation6], 4096   ;;  %p2948_p13 = pmov %p2947_p2 }
  0x8d   : > { %p2949_p7 = pmov %p2947_p2 }
  0x8e   : > { %2400 = vsyncadd (%p2948_p13), [#allocation6], 4294963200 }
  0x8f   : > { %2402 = dma.done.wait (%p2949_p7), [#allocation9], 1024   ;;  %p2950_p9 = pmov %p2947_p2 }
  0x90   : > { %v315_v0 = vlaneseq  ;;  %v2692_v4 = vld [vmem:[%s2668_s29] sm:$0xff]  ;;  %v2195_v7 = vld [vmem:[#allocation5] sm:$0xff]   ;;  %v2198_v13 = vld [vmem:[#allocation5 + $0x18] sm:$0xff]   ;;  %v2434_v61 = vmov 1.0|1.0   ;;  %s1758_s26 = sshll.u32 %s2664_s27, 3 }
  0x91   : > { %2404 = vsyncadd (%p2950_p9), [#allocation9], 4294966272  ;;  %v2196_v9 = vld [vmem:[#allocation5 + $0x8] sm:$0xff]   ;;  %1960 = vmatprep.subr.bf16.mxu0 %v2195_v7  ;;  %v2197_v10 = vld [vmem:[#allocation5 + $0x10] sm:$0xff]   ;;  %s1852_s7 = sshll.u32 %s2494_s25, 7  ;;  %s312_s16 = scalar_lea.vmem [#allocation10], %s1758_s26 }
  0x92   : > { %v2683_v1 = vshrl.u32 %v315_v0, 7  ;;  %1961 = vmatpush3.bf16.msra.mxu0 %v2195_v7  ;;  %v2203_v14 = vld [vmem:[#allocation5 + $0x40] sm:$0xff]   ;;  %v2204_v17 = vld [vmem:[#allocation5 + $0x48] sm:$0xff]   ;;  %v2206_v19 = vld [vmem:[#allocation5 + $0x50] sm:$0xff]   ;;  %v2753_v57 = vand.u32 127, %v315_v0  ;;  %s1648_s1 = sshll.u32 %s312_s16, 4  ;;  %s2870_s28 = scalar_lea.hbm %s2920_s6, %s1852_s7  ;;  %s2872_s1 = int_to_ptr.vmem [resolvable:$true] %s1648_s1 }
  0x93   : > { %1962 = vmatprep.subr.bf16.mxu0 %v2196_v9  ;;  %1928 = vmatprep.subr.bf16.mxu1 %v2203_v14  ;;  %v2199_v18 = vld [vmem:[#allocation5 + $0x20] sm:$0xff]   ;;  %v2200_v22 = vld [vmem:[#allocation5 + $0x28] sm:$0xff]   ;;  %v2208_v23 = vld [vmem:[#allocation5 + $0x58] sm:$0xff]   ;;  %s1635_s30 = scalar_lea.sflag [#allocation4], %s2664_s27  ;;  %s2349_s25 = scalar_lea.vmem %s2872_s1, 128 }
  0x94   : > { %v2686_v2 = vsub.s32 1, %v2683_v1  ;;  %v2689_v3 = vsub.s32 0, %v2683_v1  ;;  %v2699_v8 = vsub.s32 2, %v2683_v1  ;;  %v2704_v12 = vsub.s32 3, %v2683_v1  ;;  %1929 = vmatpush3.bf16.msra.mxu1 %v2203_v14  ;;  %v2201_v26 = vld [vmem:[#allocation5 + $0x30] sm:$0xff]   ;;  %v2210_v27 = vld [vmem:[#allocation5 + $0x60] sm:$0xff]   ;;  %p2350_p10 = scmp.ne.s32.totalorder %s2872_s1, %s2349_s25 }
  0x95   : > { %v2709_v16 = vsub.s32 4, %v2683_v1  ;;  %1930 = vmatprep.subr.bf16.mxu1 %v2204_v17  ;;  %v2714_v21 = vsub.s32 5, %v2683_v1  ;;  %v2719_v25 = vsub.s32 6, %v2683_v1  ;;  %v2724_v29 = vsub.s32 7, %v2683_v1  ;;  %v2202_v30 = vld [vmem:[#allocation5 + $0x38] sm:$0xff]   ;;  %v2212_v31 = vld [vmem:[#allocation5 + $0x68] sm:$0xff]  }
  0x96   : > { %v331_v5 = vrot.slane %v2692_v4, %v2686_v2  ;;  %v320_v6 = vrot.slane %v2692_v4, %v2689_v3  ;;  %v342_v11 = vrot.slane %v2692_v4, %v2699_v8  ;;  %1963 = vmatpush3.bf16.msra.mxu0 %v2196_v9  ;;  %v353_v15 = vrot.slane %v2692_v4, %v2704_v12  ;;  %v1759_v33 = vld [vmem:[%s2668_s29 + $0x8] sm:$0xff]  ;;  %v2729_v34 = vld [vmem:[#allocation5 + $0x80] sm:$0xff]   ;;  %v2207_v60 = vld [vmem:[#allocation5 + $0x88] sm:$0xff]   ;;  %p2951_p1 = scmp.ne.s32.totalorder %s2934_s9, 0  ;;  %s2437_s20 = smov [#allocation10]  }
  0x97   : > { %1964 = vmatprep.subr.bf16.mxu0 %v2197_v10  ;;  %v364_v20 = vrot.slane %v2692_v4, %v2709_v16  ;;  %v375_v24 = vrot.slane %v2692_v4, %v2714_v21  ;;  %v386_v28 = vrot.slane %v2692_v4, %v2719_v25  ;;  %v397_v32 = vrot.slane %v2692_v4, %v2724_v29  ;;  %v2214_v35 = vld [vmem:[#allocation5 + $0x70] sm:$0xff]   ;;  %v1808_v37 = vld [vmem:[%s2668_s29 + $0x10] sm:$0xff]  ;;  %s2353_s15 = sshll.u32 %s2437_s20, 4  ;;  %s2354_s15 = int_to_ptr.vmem [resolvable:$false] %s2353_s15 }
  0x98   : > { %333 = vbcast.lane.b32.xlu1 %v331_v5, 256  ;;  %322 = vbcast.lane.b32.xlu0 %v320_v6, 256  ;;  %v466_v36 = vrot.slane %v1759_v33, %v2689_v3  ;;  %v2216_v38 = vld [vmem:[#allocation5 + $0x78] sm:$0xff]   ;;  %v903_v39 = vrot.slane %v1808_v37, %v2689_v3  ;;  %v477_v40 = vrot.slane %v1759_v33, %v2686_v2  ;;  %v2747_v52 = vld [vmem:[#allocation7] sm:$0xff]   ;;  %v2209_v0 = vld [vmem:[#allocation5 + $0x90] sm:$0xff]   ;;  %p2351_p4 = pnand %p2350_p10, %p2951_p1  ;;  %s2355_s14 = scalar_lea.vmem %s2354_s15, 256 }
  0x99   : > { %1931 = vmatpush3.bf16.msra.mxu1 %v2204_v17  ;;  %v914_v41 = vrot.slane %v1808_v37, %v2686_v2  ;;  %v488_v42 = vrot.slane %v1759_v33, %v2699_v8  ;;  %v925_v43 = vrot.slane %v1808_v37, %v2699_v8  ;;  %v499_v44 = vrot.slane %v1759_v33, %v2704_v12  ;;  %v2211_v4 = vld [vmem:[#allocation5 + $0x98] sm:$0xff]   ;;  %v2213_v7 = vld [vmem:[#allocation5 + $0xa0] sm:$0xff]   ;;  %p2356_p8 = scmp.lt.s32.totalorder %s2872_s1, %s2354_s15  ;;  %p2357_p5 = scmp.lt.s32.totalorder %s2355_s14, %s2349_s25 }
  0x9a   : > { %1965 = vmatpush3.bf16.msra.mxu0 %v2197_v10  ;;  %1932 = vmatprep.subr.bf16.mxu1 %v2206_v19  ;;  %v936_v45 = vrot.slane %v1808_v37, %v2704_v12  ;;  %v510_v46 = vrot.slane %v1759_v33, %v2709_v16  ;;  %v947_v47 = vrot.slane %v1808_v37, %v2709_v16  ;;  %v2215_v10 = vld [vmem:[#allocation5 + $0xa8] sm:$0xff]   ;;  %v2218_v16 = vld [vmem:[#allocation5 + $0xb8] sm:$0xff]   ;;  %p2352_p0 = pneg %p2351_p4 }
  0x9b   : > { %1966 = vmatprep.subr.bf16.mxu0 %v2198_v13  ;;  %v521_v48 = vrot.slane %v1759_v33, %v2714_v21  ;;  %v958_v49 = vrot.slane %v1808_v37, %v2714_v21  ;;  %v532_v50 = vrot.slane %v1759_v33, %v2719_v25  ;;  %v969_v51 = vrot.slane %v1808_v37, %v2719_v25  ;;  %p2358_p11 = por %p2357_p5, %p2356_p8 }
  0x9c   : > { %337 = vbcast.lane.b32.xlu1 %v331_v5, 264  ;;  %326 = vbcast.lane.b32.xlu0 %v320_v6, 264  ;;  %v543_v53 = vrot.slane %v1759_v33, %v2724_v29  ;;  %v980_v54 = vrot.slane %v1808_v37, %v2724_v29  ;;  %v2222_v29 = vld [vmem:[#allocation7 + $0x18] sm:$0xff]  }
  0x9d   : > { %1933 = vmatpush3.bf16.msra.mxu1 %v2206_v19  ;;  %p2359_p12 = pnand %p2358_p11, %p2352_p0 }
  0x9e   : > { %1967 = vmatpush3.bf16.msra.mxu0 %v2198_v13  ;;  %1934 = vmatprep.subr.bf16.mxu1 %v2208_v23  ;;  %v2217_v13 = vld [vmem:[#allocation5 + $0xb0] sm:$0xff]  }
  0x9f   : > { %1968 = vmatprep.subr.bf16.mxu0 %v2199_v18 }
  0xa0   : > { %348 = vbcast.lane.b32.xlu1 %v342_v11, 264  ;;  %344 = vbcast.lane.b32.xlu0 %v342_v11, 256 }
  0xa1   : > { %1935 = vmatpush3.bf16.msra.mxu1 %v2208_v23  ;;  %v2220_v23 = vld [vmem:[#allocation7 + $0x8] sm:$0xff]  }
  0xa2   : > { %1969 = vmatpush3.bf16.msra.mxu0 %v2199_v18  ;;  %1936 = vmatprep.subr.bf16.mxu1 %v2210_v27 }
  0xa3   : > { %1970 = vmatprep.subr.bf16.mxu0 %v2200_v22 }
  0xa4   : > { %359 = vbcast.lane.b32.xlu1 %v353_v15, 264  ;;  %355 = vbcast.lane.b32.xlu0 %v353_v15, 256 }
  0xa5   : > { %1937 = vmatpush3.bf16.msra.mxu1 %v2210_v27 }
  0xa6   : > { %1971 = vmatpush3.bf16.msra.mxu0 %v2200_v22  ;;  %1938 = vmatprep.subr.bf16.mxu1 %v2212_v31 }
  0xa7   : > { %1972 = vmatprep.subr.bf16.mxu0 %v2201_v26 }
  0xa8   : > { %370 = vbcast.lane.b32.xlu1 %v364_v20, 264  ;;  %366 = vbcast.lane.b32.xlu0 %v364_v20, 256 }
  0xa9   : > { %1939 = vmatpush3.bf16.msra.mxu1 %v2212_v31 }
  0xaa   : > { %1973 = vmatpush3.bf16.msra.mxu0 %v2201_v26  ;;  %1940 = vmatprep.subr.bf16.mxu1 %v2214_v35  ;;  %v2221_v26 = vld [vmem:[#allocation7 + $0x10] sm:$0xff]  }
  0xab   : > { %1974 = vmatprep.subr.bf16.mxu0 %v2202_v30 }
  0xac   : > { %381 = vbcast.lane.b32.xlu1 %v375_v24, 264  ;;  %377 = vbcast.lane.b32.xlu0 %v375_v24, 256 }
  0xad   : > { %1941 = vmatpush3.bf16.msra.mxu1 %v2214_v35 }
  0xae   : > { %1975 = vmatpush3.bf16.msra.mxu0 %v2202_v30  ;;  %1942 = vmatprep.subr.bf16.mxu1 %v2216_v38 }
  0xaf   : > { %1992 = vmatprep.subr.bf16.mxu0 %v2729_v34 }
  0xb0   : > { %392 = vbcast.lane.b32.xlu1 %v386_v28, 264  ;;  %388 = vbcast.lane.b32.xlu0 %v386_v28, 256 }
  0xb1   : > { %1943 = vmatpush3.bf16.msra.mxu1 %v2216_v38 }
  0xb2   : > { %2024 = vmatprep.subr.bf16.mxu1 %v2747_v52 }
  0xb4   : > { %403 = vbcast.lane.b32.xlu1 %v397_v32, 264  ;;  %399 = vbcast.lane.b32.xlu0 %v397_v32, 256  ;;  %v2223_v32 = vld [vmem:[#allocation7 + $0x20] sm:$0xff]  }
  0xb8   : > { %472 = vbcast.lane.b32.xlu1 %v466_v36, 264  ;;  %468 = vbcast.lane.b32.xlu0 %v466_v36, 256 }
  0xbc   : > { %909 = vbcast.lane.b32.xlu1 %v903_v39, 264  ;;  %905 = vbcast.lane.b32.xlu0 %v903_v39, 256 }
  0xc0   : > { %483 = vbcast.lane.b32.xlu1 %v477_v40, 264  ;;  %479 = vbcast.lane.b32.xlu0 %v477_v40, 256 }
  0xc4   : > { %920 = vbcast.lane.b32.xlu1 %v914_v41, 264  ;;  %916 = vbcast.lane.b32.xlu0 %v914_v41, 256 }
  0xc8   : > { %494 = vbcast.lane.b32.xlu1 %v488_v42, 264  ;;  %490 = vbcast.lane.b32.xlu0 %v488_v42, 256 }
  0xcc   : > { %931 = vbcast.lane.b32.xlu1 %v925_v43, 264  ;;  %927 = vbcast.lane.b32.xlu0 %v925_v43, 256 }
  0xd0   : > { %505 = vbcast.lane.b32.xlu1 %v499_v44, 264  ;;  %501 = vbcast.lane.b32.xlu0 %v499_v44, 256 }
  0xd4   : > { %942 = vbcast.lane.b32.xlu1 %v936_v45, 264  ;;  %938 = vbcast.lane.b32.xlu0 %v936_v45, 256 }
  0xd8   : > { %516 = vbcast.lane.b32.xlu1 %v510_v46, 264  ;;  %512 = vbcast.lane.b32.xlu0 %v510_v46, 256 }
  0xdc   : > { %953 = vbcast.lane.b32.xlu1 %v947_v47, 264  ;;  %949 = vbcast.lane.b32.xlu0 %v947_v47, 256 }
  0xe0   : > { %527 = vbcast.lane.b32.xlu1 %v521_v48, 264  ;;  %523 = vbcast.lane.b32.xlu0 %v521_v48, 256 }
  0xe4   : > { %964 = vbcast.lane.b32.xlu1 %v958_v49, 264  ;;  %960 = vbcast.lane.b32.xlu0 %v958_v49, 256 }
  0xe8   : > { %538 = vbcast.lane.b32.xlu1 %v532_v50, 264  ;;  %534 = vbcast.lane.b32.xlu0 %v532_v50, 256 }
  0xec   : > { %975 = vbcast.lane.b32.xlu1 %v969_v51, 264  ;;  %971 = vbcast.lane.b32.xlu0 %v969_v51, 256 }
  0xf0   : > { %549 = vbcast.lane.b32.xlu1 %v543_v53, 264  ;;  %545 = vbcast.lane.b32.xlu0 %v543_v53, 256  ;;  %v2224_v53 = vld [vmem:[#allocation7 + $0x28] sm:$0xff]  }
  0xf4   : > { %986 = vbcast.lane.b32.xlu1 %v980_v54, 264  ;;  %982 = vbcast.lane.b32.xlu0 %v980_v54, 256  ;;  %v2225_v54 = vld [vmem:[#allocation7 + $0x30] sm:$0xff]  }
 0x10a   : > { %v334_v55 = vpop.permute.xlu1 %333  ;;  %v323_v56 = vpop.permute.xlu0 %322 }
 0x10b   : > { %vm407_vm0 = vcmp.eq.s32.totalorder %v334_v55, %v2753_v57  ;;  %vm405_vm3 = vcmp.eq.s32.totalorder %v323_v56, %v2753_v57  ;;  %v2226_v55 = vld [vmem:[#allocation7 + $0x38] sm:$0xff]  }
 0x10e   : > { %v338_v58 = vpop.permute.xlu1 %337  ;;  %v327_v59 = vpop.permute.xlu0 %326 }
 0x10f   : > { %vm408_vm1 = vcmp.eq.s32.totalorder %v338_v58, %v2753_v57  ;;  %vm406_vm2 = vcmp.eq.s32.totalorder %v327_v59, %v2753_v57 }
 0x110   : > { %vm1794_vm4 = vmpackc.low %vm408_vm1, %vm407_vm0 }
 0x111   : > { %vm1792_vm5 = vmpackc.low %vm406_vm2, %vm405_vm3 }
 0x112   : > { %1976 = vmatprep.mubr.msk.bf16.mxu0 %vm1792_vm5, %v2434_v61  ;;  %v349_v62 = vpop.permute.xlu1 %348  ;;  %v345_v63 = vpop.permute.xlu0 %344 }
 0x113   : > { %vm410_vm6 = vcmp.eq.s32.totalorder %v349_v62, %v2753_v57  ;;  %1977 = vmatmul.mubr.msk.bf16.vlgmr.msra.gmra.mrb[0].mxu0 %vm1794_vm4, %v2434_v61  ;;  %vm409_vm7 = vcmp.eq.s32.totalorder %v345_v63, %v2753_v57 }
 0x114   : > { %vm1796_vm8 = vmpackc.low %vm410_vm6, %vm409_vm7  ;;  %1993 = vmatpush3.bf16.msra.mxu0 %v2729_v34 }
 0x115   : > { %1980 = vmatprep.mubr.msk.bf16.mxu0 %vm1796_vm8, %v2434_v61  ;;  %1994 = vmatprep.subr.bf16.mxu0 %v2207_v60 }
 0x116   : > { %v360_v2 = vpop.permute.xlu1 %359  ;;  %v356_v3 = vpop.permute.xlu0 %355 }
 0x117   : > { %vm412_vm9 = vcmp.eq.s32.totalorder %v360_v2, %v2753_v57  ;;  %vm411_vm10 = vcmp.eq.s32.totalorder %v356_v3, %v2753_v57 }
 0x118   : > { %vm1798_vm11 = vmpackc.low %vm412_vm9, %vm411_vm10  ;;  %1995 = vmatpush3.bf16.msra.mxu0 %v2207_v60 }
 0x119   : > { %1996 = vmatprep.subr.bf16.mxu0 %v2209_v0 }
 0x11a   : > { %v371_v5 = vpop.permute.xlu1 %370  ;;  %v367_v6 = vpop.permute.xlu0 %366 }
 0x11b   : > { %vm414_vm12 = vcmp.eq.s32.totalorder %v371_v5, %v2753_v57  ;;  %1981 = vmatmul.mubr.msk.bf16.gmra.mrb[4].mxu0 %vm1798_vm11, %v2434_v61  ;;  %vm413_vm13 = vcmp.eq.s32.totalorder %v367_v6, %v2753_v57 }
 0x11c   : > { %vm1800_vm14 = vmpackc.low %vm414_vm12, %vm413_vm13  ;;  %1997 = vmatpush3.bf16.msra.mxu0 %v2209_v0 }
 0x11d   : > { %1984 = vmatprep.mubr.msk.bf16.mxu0 %vm1800_vm14, %v2434_v61  ;;  %1998 = vmatprep.subr.bf16.mxu0 %v2211_v4 }
 0x11e   : > { %v382_v8 = vpop.permute.xlu1 %381  ;;  %v378_v9 = vpop.permute.xlu0 %377 }
 0x11f   : > { %vm416_vm15 = vcmp.eq.s32.totalorder %v382_v8, %v2753_v57  ;;  %vm415_vm0 = vcmp.eq.s32.totalorder %v378_v9, %v2753_v57 }
 0x120   : > { %vm1802_vm1 = vmpackc.low %vm416_vm15, %vm415_vm0  ;;  %1999 = vmatpush3.bf16.msra.mxu0 %v2211_v4 }
 0x121   : > { %2000 = vmatprep.subr.bf16.mxu0 %v2213_v7 }
 0x122   : > { %v393_v11 = vpop.permute.xlu1 %392  ;;  %v389_v12 = vpop.permute.xlu0 %388 }
 0x123   : > { %vm418_vm2 = vcmp.eq.s32.totalorder %v393_v11, %v2753_v57  ;;  %1985 = vmatmul.mubr.msk.bf16.gmra.mrb[8].mxu0 %vm1802_vm1, %v2434_v61  ;;  %vm417_vm3 = vcmp.eq.s32.totalorder %v389_v12, %v2753_v57 }
 0x124   : > { %vm1804_vm4 = vmpackc.low %vm418_vm2, %vm417_vm3  ;;  %2001 = vmatpush3.bf16.msra.mxu0 %v2213_v7 }
 0x125   : > { %1988 = vmatprep.mubr.msk.bf16.mxu0 %vm1804_vm4, %v2434_v61  ;;  %2002 = vmatprep.subr.bf16.mxu0 %v2215_v10 }
 0x126   : > { %v404_v14 = vpop.permute.xlu1 %403  ;;  %v400_v15 = vpop.permute.xlu0 %399 }
 0x127   : > { %vm420_vm5 = vcmp.eq.s32.totalorder %v404_v14, %v2753_v57  ;;  %vm419_vm6 = vcmp.eq.s32.totalorder %v400_v15, %v2753_v57 }
 0x128   : > { %vm1806_vm7 = vmpackc.low %vm420_vm5, %vm419_vm6  ;;  %2003 = vmatpush3.bf16.msra.mxu0 %v2215_v10 }
 0x129   : > { %2004 = vmatprep.subr.bf16.mxu0 %v2217_v13 }
 0x12a   : > { %v473_v17 = vpop.permute.xlu1 %472  ;;  %v469_v18 = vpop.permute.xlu0 %468 }
 0x12b   : > { %vm552_vm8 = vcmp.eq.s32.totalorder %v473_v17, %v2753_v57  ;;  %1989 = vmatmul.mubr.msk.bf16.gmra.mrb[12].mxu0 %vm1806_vm7, %v2434_v61  ;;  %vm551_vm9 = vcmp.eq.s32.totalorder %v469_v18, %v2753_v57 }
 0x12c   : > { %vm1768_vm10 = vmpackc.low %vm552_vm8, %vm551_vm9  ;;  %2005 = vmatpush3.bf16.msra.mxu0 %v2217_v13 }
 0x12d   : > { %1944 = vmatprep.mubr.msk.bf16.mxu1 %vm1768_vm10, %v2434_v61  ;;  %2006 = vmatprep.subr.bf16.mxu0 %v2218_v16 }
 0x12e   : > { %v910_v19 = vpop.permute.xlu1 %909  ;;  %v906_v20 = vpop.permute.xlu0 %905 }
 0x12f   : > { %vm989_vm11 = vcmp.eq.s32.totalorder %v910_v19, %v2753_v57  ;;  %vm988_vm12 = vcmp.eq.s32.totalorder %v906_v20, %v2753_v57 }
 0x130   : > { %vm1817_vm13 = vmpackc.low %vm989_vm11, %vm988_vm12  ;;  %2007 = vmatpush3.bf16.msra.mxu0 %v2218_v16 }
 0x131   : > { %2008 = vmatprep.mubr.msk.bf16.mxu0 %vm1817_vm13, %v2434_v61 }
 0x132   : > { %v484_v21 = vpop.permute.xlu1 %483  ;;  %v480_v22 = vpop.permute.xlu0 %479 }
 0x133   : > { %vm554_vm14 = vcmp.eq.s32.totalorder %v484_v21, %v2753_v57  ;;  %vm553_vm15 = vcmp.eq.s32.totalorder %v480_v22, %v2753_v57 }
 0x134   : > { %vm1770_vm0 = vmpackc.low %vm554_vm14, %vm553_vm15 }
 0x135   : > { %1945 = vmatmul.mubr.msk.bf16.vlgmr.msra.gmra.mrb[0].mxu1 %vm1770_vm0, %v2434_v61 }
 0x136   : > { %v921_v24 = vpop.permute.xlu1 %920  ;;  %v917_v25 = vpop.permute.xlu0 %916  ;;  %2025 = vmatpush3.bf16.msra.mxu1 %v2747_v52 }
 0x137   : > { %vm991_vm1 = vcmp.eq.s32.totalorder %v921_v24, %v2753_v57  ;;  %vm990_vm2 = vcmp.eq.s32.totalorder %v917_v25, %v2753_v57  ;;  %2026 = vmatprep.subr.bf16.mxu1 %v2220_v23 }
 0x138   : > { %vm1819_vm3 = vmpackc.low %vm991_vm1, %vm990_vm2 }
 0x139   : > { %2009 = vmatmul.mubr.msk.bf16.vlgmr.msra.gmra.mrb[0].mxu0 %vm1819_vm3, %v2434_v61 }
 0x13a   : > { %v495_v27 = vpop.permute.xlu1 %494  ;;  %v491_v28 = vpop.permute.xlu0 %490  ;;  %2027 = vmatpush3.bf16.msra.mxu1 %v2220_v23 }
 0x13b   : > { %vm556_vm4 = vcmp.eq.s32.totalorder %v495_v27, %v2753_v57  ;;  %vm555_vm5 = vcmp.eq.s32.totalorder %v491_v28, %v2753_v57  ;;  %2028 = vmatprep.subr.bf16.mxu1 %v2221_v26 }
 0x13c   : > { %vm1772_vm6 = vmpackc.low %vm556_vm4, %vm555_vm5 }
 0x13d   : > { %1948 = vmatprep.mubr.msk.bf16.mxu1 %vm1772_vm6, %v2434_v61 }
 0x13e   : > { %v932_v30 = vpop.permute.xlu1 %931  ;;  %v928_v31 = vpop.permute.xlu0 %927  ;;  %2029 = vmatpush3.bf16.msra.mxu1 %v2221_v26 }
 0x13f   : > { %vm993_vm7 = vcmp.eq.s32.totalorder %v932_v30, %v2753_v57  ;;  %vm992_vm8 = vcmp.eq.s32.totalorder %v928_v31, %v2753_v57  ;;  %2030 = vmatprep.subr.bf16.mxu1 %v2222_v29 }
 0x140   : > { %vm1821_vm9 = vmpackc.low %vm993_vm7, %vm992_vm8 }
 0x141   : > { %2012 = vmatprep.mubr.msk.bf16.mxu0 %vm1821_vm9, %v2434_v61 }
 0x142   : > { %v506_v33 = vpop.permute.xlu1 %505  ;;  %v502_v34 = vpop.permute.xlu0 %501  ;;  %2031 = vmatpush3.bf16.msra.mxu1 %v2222_v29 }
 0x143   : > { %vm558_vm10 = vcmp.eq.s32.totalorder %v506_v33, %v2753_v57  ;;  %vm557_vm11 = vcmp.eq.s32.totalorder %v502_v34, %v2753_v57  ;;  %2032 = vmatprep.subr.bf16.mxu1 %v2223_v32 }
 0x144   : > { %vm1774_vm12 = vmpackc.low %vm558_vm10, %vm557_vm11 }
 0x145   : > { %1949 = vmatmul.mubr.msk.bf16.gmra.mrb[4].mxu1 %vm1774_vm12, %v2434_v61 }
 0x146   : > { %v943_v35 = vpop.permute.xlu1 %942  ;;  %v939_v36 = vpop.permute.xlu0 %938  ;;  %2033 = vmatpush3.bf16.msra.mxu1 %v2223_v32 }
 0x147   : > { %vm995_vm13 = vcmp.eq.s32.totalorder %v943_v35, %v2753_v57  ;;  %vm994_vm14 = vcmp.eq.s32.totalorder %v939_v36, %v2753_v57  ;;  %2034 = vmatprep.subr.bf16.mxu1 %v2224_v53 }
 0x148   : > { %vm1823_vm15 = vmpackc.low %vm995_vm13, %vm994_vm14 }
 0x149   : > { %2013 = vmatmul.mubr.msk.bf16.gmra.mrb[4].mxu0 %vm1823_vm15, %v2434_v61 }
 0x14a   : > { %v517_v37 = vpop.permute.xlu1 %516  ;;  %v513_v38 = vpop.permute.xlu0 %512  ;;  %2035 = vmatpush3.bf16.msra.mxu1 %v2224_v53  ;;  %v2230_v53 = vld [vmem:[#allocation8 + $0x18] sm:$0xff]  }
 0x14b   : > { %vm560_vm0 = vcmp.eq.s32.totalorder %v517_v37, %v2753_v57  ;;  %vm559_vm1 = vcmp.eq.s32.totalorder %v513_v38, %v2753_v57  ;;  %2036 = vmatprep.subr.bf16.mxu1 %v2225_v54 }
 0x14c   : > { %vm1776_vm2 = vmpackc.low %vm560_vm0, %vm559_vm1 }
 0x14d   : > { %1952 = vmatprep.mubr.msk.bf16.mxu1 %vm1776_vm2, %v2434_v61 }
 0x14e   : > { %v954_v39 = vpop.permute.xlu1 %953  ;;  %v950_v40 = vpop.permute.xlu0 %949  ;;  %2037 = vmatpush3.bf16.msra.mxu1 %v2225_v54  ;;  %v2231_v54 = vld [vmem:[#allocation8 + $0x20] sm:$0xff]  }
 0x14f   : > { %vm997_vm3 = vcmp.eq.s32.totalorder %v954_v39, %v2753_v57  ;;  %vm996_vm4 = vcmp.eq.s32.totalorder %v950_v40, %v2753_v57  ;;  %2038 = vmatprep.subr.bf16.mxu1 %v2226_v55 }
 0x150   : > { %vm1825_vm5 = vmpackc.low %vm997_vm3, %vm996_vm4 }
 0x151   : > { %2016 = vmatprep.mubr.msk.bf16.mxu0 %vm1825_vm5, %v2434_v61 }
 0x152   : > { %v528_v41 = vpop.permute.xlu1 %527  ;;  %v524_v42 = vpop.permute.xlu0 %523  ;;  %2039 = vmatpush3.bf16.msra.mxu1 %v2226_v55  ;;  %v2232_v55 = vld [vmem:[#allocation8 + $0x28] sm:$0xff]  }
 0x153   : > { %vm562_vm6 = vcmp.eq.s32.totalorder %v528_v41, %v2753_v57  ;;  %vm561_vm7 = vcmp.eq.s32.totalorder %v524_v42, %v2753_v57 }
 0x154   : > { %vm1778_vm8 = vmpackc.low %vm562_vm6, %vm561_vm7 }
 0x155   : > { %1953 = vmatmul.mubr.msk.bf16.gmra.mrb[8].mxu1 %vm1778_vm8, %v2434_v61  ;;  %vm2436_vm8 = vmmov 0  }
 0x156   : > { %v965_v43 = vpop.permute.xlu1 %964  ;;  %v961_v44 = vpop.permute.xlu0 %960 }
 0x157   : > { %vm999_vm9 = vcmp.eq.s32.totalorder %v965_v43, %v2753_v57  ;;  %vm998_vm10 = vcmp.eq.s32.totalorder %v961_v44, %v2753_v57 }
 0x158   : > { %vm1827_vm11 = vmpackc.low %vm999_vm9, %vm998_vm10  ;;  %vm1523_vm10 = vcmask 1041409  }
 0x159   : > { %2017 = vmatmul.mubr.msk.bf16.gmra.mrb[8].mxu0 %vm1827_vm11, %v2434_v61  ;;  %vm1526_vm11 = vcmask 1042434  }
 0x15a   : > { %v539_v45 = vpop.permute.xlu1 %538  ;;  %v535_v46 = vpop.permute.xlu0 %534 }
 0x15b   : > { %vm564_vm12 = vcmp.eq.s32.totalorder %v539_v45, %v2753_v57  ;;  %vm563_vm13 = vcmp.eq.s32.totalorder %v535_v46, %v2753_v57 }
 0x15c   : > { %vm1780_vm14 = vmpackc.low %vm564_vm12, %vm563_vm13  ;;  %vm1529_vm12 = vcmask 1043459   ;;  %vm1532_vm13 = vcmask 1044484  }
 0x15d   : > { %1956 = vmatprep.mubr.msk.bf16.mxu1 %vm1780_vm14, %v2434_v61  ;;  %vm1535_vm14 = vcmask 1045509  }
 0x15e   : > { %v976_v47 = vpop.permute.xlu1 %975  ;;  %v972_v48 = vpop.permute.xlu0 %971 }
 0x15f   : > { %vm1001_vm15 = vcmp.eq.s32.totalorder %v976_v47, %v2753_v57  ;;  %vm1000_vm0 = vcmp.eq.s32.totalorder %v972_v48, %v2753_v57 }
 0x160   : > { %vm1829_vm1 = vmpackc.low %vm1001_vm15, %vm1000_vm0  ;;  %vm1538_vm15 = vcmask 1046534   ;;  %vm1541_vm0 = vcmask 1047559  }
 0x161   : > { %2020 = vmatprep.mubr.msk.bf16.mxu0 %vm1829_vm1, %v2434_v61 }
 0x162   : > { %v550_v49 = vpop.permute.xlu1 %549  ;;  %v546_v50 = vpop.permute.xlu0 %545 }
 0x163   : > { %vm566_vm2 = vcmp.eq.s32.totalorder %v550_v49, %v2753_v57  ;;  %vm565_vm3 = vcmp.eq.s32.totalorder %v546_v50, %v2753_v57  ;;  %v2227_v49 = vld [vmem:[#allocation8] sm:$0xff]   ;;  %v2435_v50 = vmov 0.0  }
 0x164   : > { %vm1782_vm4 = vmpackc.low %vm566_vm2, %vm565_vm3  ;;  %2056 = vmatprep.subr.bf16.mxu1 %v2435_v50 }
 0x165   : > { %1957 = vmatmul.mubr.msk.bf16.gmra.mrb[12].mxu1 %vm1782_vm4, %v2434_v61 }
 0x166   : > { %v987_v51 = vpop.permute.xlu1 %986  ;;  %v983_v52 = vpop.permute.xlu0 %982 }
 0x167   : > { %vm1003_vm5 = vcmp.eq.s32.totalorder %v987_v51, %v2753_v57  ;;  %vm1002_vm6 = vcmp.eq.s32.totalorder %v983_v52, %v2753_v57  ;;  %v2228_v51 = vld [vmem:[#allocation8 + $0x8] sm:$0xff]   ;;  %v2229_v52 = vld [vmem:[#allocation8 + $0x10] sm:$0xff]  }
 0x168   : > { %vm1831_vm7 = vmpackc.low %vm1003_vm5, %vm1002_vm6 }
 0x169   : > { %2021 = vmatmul.mubr.msk.bf16.gmra.mrb[12].mxu0 %vm1831_vm7, %v2434_v61 }
 0x208   : > { %v1946_v56 = vpop.f32.mrb[0].mxu1 }
 0x209   : > { %v690_v58 = vpop.f32.mrb[1].mxu1 }
 0x20a   : > { %v1947_v59 = vpop.f32.mrb[2].mxu1 }
 0x20b   : > { %v693_v60 = vpop.f32.mrb[3].mxu1 }
 0x20c   : > { %v2010_v62 = vpop.f32.mrb[0].mxu0 }
 0x20d   : > { %v2076_v63 = vadd.f32 %v2010_v62, %v1946_v56  ;;  %v1127_v0 = vpop.f32.mrb[1].mxu0  ;;  %v2233_v56 = vld [vmem:[#allocation8 + $0x30] sm:$0xff]  }
 0x20e   : > { %v2077_v57 = vadd.f32 %v1127_v0, %v690_v58  ;;  %v2011_v2 = vpop.f32.mrb[2].mxu0  ;;  %v2234_v58 = vld [vmem:[#allocation8 + $0x38] sm:$0xff]  }
 0x20f   : > { %v2078_v3 = vadd.f32 %v2011_v2, %v1947_v59  ;;  %v1130_v61 = vpop.f32.mrb[3].mxu0  ;;  %v2830_v59 = vadd.s32 8, %v2683_v1 }
 0x210   : > { %v2079_v4 = vadd.f32 %v1130_v61, %v693_v60 }
 0x211   : > { %v1207_v5 = vpack.c.bf16 %v2078_v3, %v2076_v63  ;;  %vm1379_vm9 = vcmp.lt.s32.totalorder %v2830_v59, 14 }
 0x212   : > { %v1206_v6 = vpack.c.bf16 %v2079_v4, %v2077_v57 }
 0x214   : > { %2040 = vmatprep.mubr.bf16.mxu1 %v1206_v6 }
 0x215   : > { %2041 = vmatmul.mubr.bf16.vlgmr.msra.gmra.mrb[16].mxu1 %v1207_v5 }
 0x216   : > { %2057 = vmatpush3.bf16.msra.mxu1 %v2227_v49 }
 0x217   : > { %2058 = vmatprep.subr.bf16.mxu1 %v2435_v50 }
 0x218   : > { %v1950_v7 = vpop.f32.mrb[4].mxu1 }
 0x219   : > { %v706_v8 = vpop.f32.mrb[5].mxu1 }
 0x21a   : > { %v1951_v9 = vpop.f32.mrb[6].mxu1  ;;  %2059 = vmatpush3.bf16.msra.mxu1 %v2228_v51 }
 0x21b   : > { %v709_v10 = vpop.f32.mrb[7].mxu1  ;;  %2060 = vmatprep.subr.bf16.mxu1 %v2435_v50 }
 0x21c   : > { %v2014_v11 = vpop.f32.mrb[4].mxu0 }
 0x21d   : > { %v2080_v12 = vadd.f32 %v2014_v11, %v1950_v7  ;;  %v1143_v13 = vpop.f32.mrb[5].mxu0 }
 0x21e   : > { %v2081_v14 = vadd.f32 %v1143_v13, %v706_v8  ;;  %v2015_v15 = vpop.f32.mrb[6].mxu0  ;;  %2061 = vmatpush3.bf16.msra.mxu1 %v2229_v52 }
 0x21f   : > { %v2082_v16 = vadd.f32 %v2015_v15, %v1951_v9  ;;  %v1146_v17 = vpop.f32.mrb[7].mxu0  ;;  %2062 = vmatprep.subr.bf16.mxu1 %v2435_v50 }
 0x220   : > { %v2083_v18 = vadd.f32 %v1146_v17, %v709_v10 }
 0x221   : > { %v1209_v19 = vpack.c.bf16 %v2082_v16, %v2080_v12  ;;  %v2840_v12 = vld [vmem:[%s2917_s3] ss:$0 sm:$0xff] }
 0x222   : > { %v1208_v20 = vpack.c.bf16 %v2083_v18, %v2081_v14  ;;  %2063 = vmatpush3.bf16.msra.mxu1 %v2230_v53 }
 0x223   : > { %2064 = vmatprep.subr.bf16.mxu1 %v2435_v50 }
 0x224   : > { %2044 = vmatprep.mubr.bf16.mxu1 %v1208_v20 }
 0x225   : > { %2045 = vmatmul.mubr.bf16.gmra.mrb[20].mxu1 %v1209_v19 }
 0x226   : > { %2065 = vmatpush3.bf16.msra.mxu1 %v2231_v54 }
 0x227   : > { %2066 = vmatprep.subr.bf16.mxu1 %v2435_v50 }
 0x228   : > { %v1954_v21 = vpop.f32.mrb[8].mxu1 }
 0x229   : > { %v722_v22 = vpop.f32.mrb[9].mxu1 }
 0x22a   : > { %v1955_v23 = vpop.f32.mrb[10].mxu1  ;;  %2067 = vmatpush3.bf16.msra.mxu1 %v2232_v55 }
 0x22b   : > { %v725_v24 = vpop.f32.mrb[11].mxu1  ;;  %2068 = vmatprep.subr.bf16.mxu1 %v2435_v50 }
 0x22c   : > { %v2018_v25 = vpop.f32.mrb[8].mxu0 }
 0x22d   : > { %v2084_v26 = vadd.f32 %v2018_v25, %v1954_v21  ;;  %v1159_v27 = vpop.f32.mrb[9].mxu0 }
 0x22e   : > { %v2085_v28 = vadd.f32 %v1159_v27, %v722_v22  ;;  %v2019_v29 = vpop.f32.mrb[10].mxu0  ;;  %2069 = vmatpush3.bf16.msra.mxu1 %v2233_v56 }
 0x22f   : > { %v2086_v30 = vadd.f32 %v2019_v29, %v1955_v23  ;;  %v1162_v31 = vpop.f32.mrb[11].mxu0  ;;  %2070 = vmatprep.subr.bf16.mxu1 %v2435_v50 }
 0x230   : > { %v2087_v32 = vadd.f32 %v1162_v31, %v725_v24 }
 0x231   : > { %v1211_v33 = vpack.c.bf16 %v2086_v30, %v2084_v26 }
 0x232   : > { %v1210_v34 = vpack.c.bf16 %v2087_v32, %v2085_v28  ;;  %2071 = vmatpush3.bf16.msra.mxu1 %v2234_v58 }
 0x234   : > { %2048 = vmatprep.mubr.bf16.mxu1 %v1210_v34 }
 0x235   : > { %2049 = vmatmul.mubr.bf16.gmra.mrb[24].mxu1 %v1211_v33 }
 0x238   : > { %v1958_v35 = vpop.f32.mrb[12].mxu1 }
 0x239   : > { %v738_v36 = vpop.f32.mrb[13].mxu1 }
 0x23a   : > { %v1959_v37 = vpop.f32.mrb[14].mxu1 }
 0x23b   : > { %v741_v38 = vpop.f32.mrb[15].mxu1 }
 0x23c   : > { %v2022_v39 = vpop.f32.mrb[12].mxu0 }
 0x23d   : > { %v2088_v40 = vadd.f32 %v2022_v39, %v1958_v35  ;;  %v1175_v41 = vpop.f32.mrb[13].mxu0 }
 0x23e   : > { %v2089_v42 = vadd.f32 %v1175_v41, %v738_v36  ;;  %v2023_v43 = vpop.f32.mrb[14].mxu0 }
 0x23f   : > { %v2090_v44 = vadd.f32 %v2023_v43, %v1959_v37  ;;  %v1178_v45 = vpop.f32.mrb[15].mxu0 }
 0x240   : > { %v2091_v46 = vadd.f32 %v1178_v45, %v741_v38 }
 0x241   : > { %v1213_v47 = vpack.c.bf16 %v2090_v44, %v2088_v40 }
 0x242   : > { %v1212_v48 = vpack.c.bf16 %v2091_v46, %v2089_v42 }
 0x244   : > { %2052 = vmatprep.mubr.bf16.mxu1 %v1212_v48 }
 0x245   : > { %2053 = vmatmul.mubr.bf16.gmra.mrb[28].mxu1 %v1213_v47 }
 0x246   : > { %2072 = vmatprep.mubr.msk.bf16.mxu1 %vm2436_vm8, %v2435_v50 }
 0x2e8   : > { %v2042_v60 = vpop.f32.mrb[16].mxu1 }
 0x2e9   : > { %v1312_v62 = vpop.f32.mrb[17].mxu1 }
 0x2ea   : > { %v2043_v63 = vpop.f32.mrb[18].mxu1 }
 0x2eb   : > { %v1383_v0 = vsel %vm1379_vm9, %v2043_v63, -inf  ;;  %v1315_v57 = vpop.f32.mrb[19].mxu1 }
 0x2ec   : > { %v1403_v2 = vmax.f32 %v2042_v60, %v1383_v0  ;;  %v1381_v3 = vsel %vm1379_vm9, %v1315_v57, -inf }
 0x2ed   : > { %v1396_v61 = vmax.f32 %v1312_v62, %v1381_v3 }
 0x2ee   : > { %v1404_v4 = vrot.slane %v1403_v2, 4 }
 0x2ef   : > { %v1397_v5 = vrot.slane %v1396_v61, 4 }
 0x2f0   : > { %v1405_v6 = vmax.f32 %v1403_v2, %v1404_v4 }
 0x2f1   : > { %v1398_v7 = vmax.f32 %v1396_v61, %v1397_v5 }
 0x2f2   : > { %v1406_v1 = vrot.slane %v1405_v6, 2 }
 0x2f3   : > { %v1399_v8 = vrot.slane %v1398_v7, 2 }
 0x2f4   : > { %v1407_v9 = vmax.f32 %v1405_v6, %v1406_v1 }
 0x2f5   : > { %v1400_v10 = vmax.f32 %v1398_v7, %v1399_v8 }
 0x2f6   : > { %v1408_v11 = vrot.slane %v1407_v9, 1 }
 0x2f7   : > { %v1401_v13 = vrot.slane %v1400_v10, 1 }
 0x2f8   : > { %v1409_v14 = vmax.f32 %v1407_v9, %v1408_v11  ;;  %v2046_v15 = vpop.f32.mrb[20].mxu1 }
 0x2f9   : > { %v1402_v16 = vmax.f32 %v1400_v10, %v1401_v13  ;;  %v1328_v17 = vpop.f32.mrb[21].mxu1 }
 0x2fa   : > { %v1460_v18 = vadd.f32 %v2840_v12, %v1409_v14  ;;  %v2047_v19 = vpop.f32.mrb[22].mxu1 }
 0x2fb   : > { %v1459_v20 = vadd.f32 %v2840_v12, %v1402_v16  ;;  %v1387_v21 = vsel %vm1379_vm9, %v2047_v19, -inf  ;;  %v1331_v22 = vpop.f32.mrb[23].mxu1 }
 0x2fc   : > { %v1468_v23 = vmax.f32 %v1460_v18, 0.0  ;;  %v1417_v24 = vmax.f32 %v2046_v15, %v1387_v21  ;;  %v1385_v25 = vsel %vm1379_vm9, %v1331_v22, -inf }
 0x2fd   : > { %v1467_v26 = vmax.f32 %v1459_v20, 0.0  ;;  %v1410_v27 = vmax.f32 %v1328_v17, %v1385_v25 }
 0x2fe   : > { %v1476_v28 = vpack.c.bf16 %v1468_v23, %v1468_v23  ;;  %v1418_v29 = vrot.slane %v1417_v24, 4 }
 0x2ff   : > { %v1475_v30 = vpack.c.bf16 %v1467_v26, %v1467_v26  ;;  %v1411_v31 = vrot.slane %v1410_v27, 4 }
 0x300   : > { %v1515_v32 = vunpack.c.l.b16 %v1476_v28  ;;  %v1419_v33 = vmax.f32 %v1417_v24, %v1418_v29 }
 0x301   : > { %v1514_v34 = vunpack.c.l.b16 %v1475_v30  ;;  %v1412_v35 = vmax.f32 %v1410_v27, %v1411_v31 }
 0x302   : > { %v1522_v36 = vrot.slane %v1515_v32, 7  ;;  %v1420_v37 = vrot.slane %v1419_v33, 2 }
 0x303   : > { %v1413_v38 = vrot.slane %v1412_v35, 2 }
 0x304   : > { %v1524_v39 = vsel %vm1523_vm10, %v1522_v36, %v1514_v34  ;;  %v1421_v40 = vmax.f32 %v1419_v33, %v1420_v37 }
 0x305   : > { %v1414_v41 = vmax.f32 %v1412_v35, %v1413_v38 }
 0x306   : > { %v1422_v42 = vrot.slane %v1421_v40, 1 }
 0x307   : > { %v1415_v43 = vrot.slane %v1414_v41, 1 }
 0x308   : > { %v1423_v44 = vmax.f32 %v1421_v40, %v1422_v42  ;;  %v2050_v45 = vpop.f32.mrb[24].mxu1 }
 0x309   : > { %v1416_v46 = vmax.f32 %v1414_v41, %v1415_v43  ;;  %v1344_v47 = vpop.f32.mrb[25].mxu1 }
 0x30a   : > { %v1462_v48 = vadd.f32 %v2840_v12, %v1423_v44  ;;  %v2051_v49 = vpop.f32.mrb[26].mxu1 }
 0x30b   : > { %v1461_v50 = vadd.f32 %v2840_v12, %v1416_v46  ;;  %v1391_v51 = vsel %vm1379_vm9, %v2051_v49, -inf  ;;  %v1347_v52 = vpop.f32.mrb[27].mxu1 }
 0x30c   : > { %v1470_v53 = vmax.f32 %v1462_v48, 0.0  ;;  %v1431_v54 = vmax.f32 %v2050_v45, %v1391_v51  ;;  %v1389_v55 = vsel %vm1379_vm9, %v1347_v52, -inf }
 0x30d   : > { %v1469_v56 = vmax.f32 %v1461_v50, 0.0  ;;  %v1424_v58 = vmax.f32 %v1344_v47, %v1389_v55 }
 0x30e   : > { %v1478_v60 = vpack.c.bf16 %v1470_v53, %v1470_v53  ;;  %v1432_v62 = vrot.slane %v1431_v54, 4 }
 0x30f   : > { %v1477_v63 = vpack.c.bf16 %v1469_v56, %v1469_v56  ;;  %v1425_v0 = vrot.slane %v1424_v58, 4 }
 0x310   : > { %v1517_v57 = vunpack.c.l.b16 %v1478_v60  ;;  %v1433_v2 = vmax.f32 %v1431_v54, %v1432_v62 }
 0x311   : > { %v1516_v3 = vunpack.c.l.b16 %v1477_v63  ;;  %v1426_v61 = vmax.f32 %v1424_v58, %v1425_v0 }
 0x312   : > { %v1434_v4 = vrot.slane %v1433_v2, 2  ;;  %v1528_v7 = vrot.slane %v1517_v57, 5 }
 0x313   : > { %v1525_v5 = vrot.slane %v1516_v3, 6  ;;  %v1427_v6 = vrot.slane %v1426_v61, 2 }
 0x314   : > { %v1435_v1 = vmax.f32 %v1433_v2, %v1434_v4 }
 0x315   : > { %v1527_v8 = vsel %vm1526_vm11, %v1525_v5, %v1524_v39  ;;  %v1428_v9 = vmax.f32 %v1426_v61, %v1427_v6 }
 0x316   : > { %v1436_v10 = vrot.slane %v1435_v1, 1  ;;  %v1530_v11 = vsel %vm1529_vm12, %v1528_v7, %v1527_v8 }
 0x317   : > { %v1429_v13 = vrot.slane %v1428_v9, 1 }
 0x318   : > { %v1437_v14 = vmax.f32 %v1435_v1, %v1436_v10  ;;  %v2054_v15 = vpop.f32.mrb[28].mxu1 }
 0x319   : > { %v1430_v16 = vmax.f32 %v1428_v9, %v1429_v13  ;;  %v1360_v17 = vpop.f32.mrb[29].mxu1 }
 0x31a   : > { %v1464_v18 = vadd.f32 %v2840_v12, %v1437_v14  ;;  %v2055_v19 = vpop.f32.mrb[30].mxu1 }
 0x31b   : > { %v1463_v20 = vadd.f32 %v2840_v12, %v1430_v16  ;;  %v1395_v21 = vsel %vm1379_vm9, %v2055_v19, -inf  ;;  %v1363_v22 = vpop.f32.mrb[31].mxu1 }
 0x31c   : > { %v1472_v23 = vmax.f32 %v1464_v18, 0.0  ;;  %v1445_v24 = vmax.f32 %v2054_v15, %v1395_v21  ;;  %v1393_v25 = vsel %vm1379_vm9, %v1363_v22, -inf }
 0x31d   : > { %v1471_v26 = vmax.f32 %v1463_v20, 0.0  ;;  %v1438_v27 = vmax.f32 %v1360_v17, %v1393_v25 }
 0x31e   : > { %v1480_v28 = vpack.c.bf16 %v1472_v23, %v1472_v23  ;;  %v1446_v29 = vrot.slane %v1445_v24, 4 }
 0x31f   : > { %v1479_v30 = vpack.c.bf16 %v1471_v26, %v1471_v26  ;;  %v1439_v31 = vrot.slane %v1438_v27, 4 }
 0x320   : > { %v1519_v32 = vunpack.c.l.b16 %v1480_v28  ;;  %v1447_v33 = vmax.f32 %v1445_v24, %v1446_v29 }
 0x321   : > { %v1518_v34 = vunpack.c.l.b16 %v1479_v30  ;;  %v1440_v35 = vmax.f32 %v1438_v27, %v1439_v31 }
 0x322   : > { %v1448_v36 = vrot.slane %v1447_v33, 2  ;;  %v1534_v39 = vrot.slane %v1519_v32, 3 }
 0x323   : > { %v1531_v37 = vrot.slane %v1518_v34, 4  ;;  %v1441_v38 = vrot.slane %v1440_v35, 2 }
 0x324   : > { %v1449_v40 = vmax.f32 %v1447_v33, %v1448_v36 }
 0x325   : > { %v1533_v41 = vsel %vm1532_vm13, %v1531_v37, %v1530_v11  ;;  %v1442_v59 = vmax.f32 %v1440_v35, %v1441_v38 }
 0x326   : > { %v1450_v42 = vrot.slane %v1449_v40, 1  ;;  %v1536_v43 = vsel %vm1535_vm14, %v1534_v39, %v1533_v41 }
 0x327   : > { %v1443_v44 = vrot.slane %v1442_v59, 1 }
 0x328   : > { %v1451_v45 = vmax.f32 %v1449_v40, %v1450_v42 }
 0x329   : > { %v1444_v46 = vmax.f32 %v1442_v59, %v1443_v44 }
 0x32a   : > { %v1466_v47 = vadd.f32 %v2840_v12, %v1451_v45 }
 0x32b   : > { %v1465_v48 = vadd.f32 %v2840_v12, %v1444_v46  ;;  %v1842_v12 = vld [vmem:[%s2919_s5] ss:$0 sm:$0xff] }
 0x32c   : > { %v1474_v49 = vmax.f32 %v1466_v47, 0.0 }
 0x32d   : > { %v1473_v50 = vmax.f32 %v1465_v48, 0.0 }
 0x32e   : > { %v1482_v51 = vpack.c.bf16 %v1474_v49, %v1474_v49 }
 0x32f   : > { %v1481_v52 = vpack.c.bf16 %v1473_v50, %v1473_v50 }
 0x330   : > { %v1521_v53 = vunpack.c.l.b16 %v1482_v51 }
 0x331   : > { %v1520_v54 = vunpack.c.l.b16 %v1481_v52 }
 0x332   : > { %v1540_v56 = vrot.slane %v1521_v53, 1 }
 0x333   : > { %v1537_v55 = vrot.slane %v1520_v54, 2 }
 0x335   : > { %v1539_v58 = vsel %vm1538_vm15, %v1537_v55, %v1536_v43 }
 0x336   : > { %v1542_v60 = vsel %vm1541_vm0, %v1540_v56, %v1539_v58 }
 0x337   : > { %v1543_v62 = vpack.c.b16 %v1542_v60, %v1542_v60 }
 0x339   : > { %2073 = vmatmul.mubr.bf16.vlgmr.msra.gmra.mrb[32].mxu1 %v1543_v62 }
 0x40c   : > { %v1627_v63 = vpop.f32.mrb[32].mxu1 }
 0x40d   : > { %v1628_v0 = vadd.f32 %v1842_v12, %v1627_v63  ;;  %v2074_v57 = vpop.f32.mrb[33].mxu1 }
 0x40e   : > { %v1630_v2 = vpop.f32.mrb[34].mxu1 }
 0x40f   : > { %1633 = vst [vmem:[%s312_s16] sm:$0xff] %v1628_v0  ;;  %v2075_v3 = vpop.f32.mrb[35].mxu1 }
 0x410   : > { %2362 = shalt.err (!%p2359_p12)
}
 0x411   : > { %s2363_s27 = scalar_lea.hbm %s2870_s28, 128  ;;  %s2367_s29 = scalar_lea.hbm %s2920_s6, 256 }
 0x412   : > { %p2364_p3 = scmp.ne.s32.totalorder %s2870_s28, %s2363_s27  ;;  %p2368_p13 = scmp.lt.u32.totalorder %s2870_s28, %s2920_s6 }
 0x413   : > { %p2369_p7 = scmp.lt.u32.totalorder %s2367_s29, %s2363_s27  ;;  %p2371_p10 = scmp.lt.u32.totalorder %s2363_s27, %s2870_s28 }
 0x414   : > { %p2365_p6 = pnand %p2364_p3, %p2951_p1 }
 0x415   : > { %p2370_p9 = por %p2369_p7, %p2368_p13 }
 0x416   : > { %p2366_p2 = pneg %p2365_p6 }
 0x417   : > { %p2372_p4 = por %p2371_p10, %p2370_p9 }
 0x419   : > { %p2373_p0 = pnand %p2372_p4, %p2366_p2 }
 0x41b   : > { %2376 = shalt.err (!%p2373_p0)
}
 0x41c   : > { %2124 = dma.vmem_to_hbm [thread:$0]  (%p2951_p1), %s2872_s1, 128, %s2870_s28, %s1635_s30  }
 0x41d PF: > { %s2952_s26 = sld [smem:[#allocation17_spill]]  ;;  %s1660_s19 = sand.u32 1, %s2411_s21  }
 0x41e   : > { %p2954_p5 = scmp.ge.s32.totalorder %s2423_s24, 2  ;;  %s1661_s13 = scalar_lea.sflag [#allocation4], %s1660_s19 }
 0x423   : > { %p2953_p8 = scmp.ne.s32.totalorder %s2952_s26, 0 }
 0x425   : > { %p2141_p11 = pnand %p2954_p5, %p2953_p8 }
 0x427   : > { %2406 = dma.done.wait (!%p2141_p11), %s1661_s13, 128  }
 0x428   : > { %2408 = vsyncadd (!%p2141_p11), %s1661_s13, 4294967168  ;;  %s2955_s24 = sld [smem:[#allocation15_spill]]  ;;  %s2956_s7 = sld [smem:[#allocation16_spill]] }
 0x429   : > { %s2957_s21 = smov %s2415_s22  ;;  %s2958_s22 = smov %s2419_s23 }
 0x42e   : > { %p21_p12 = scmp.ge.s32.totalorder %s2955_s24, 4   ;;  %s2959_s23 = smov %s2956_s7 }
 0x430   :  { %23 = sbr.rel (!%p21_p12) target bundleno = 9 (0x9), region = 105 }
 0x437   :  { %1666 = vsyncpa [#allocation3], 1 }
 0x438   :  { %1668 = vsyncpa [#allocation3 + $0x1], 1 }
 0x439   :  { %1669 = vsyncpa [#allocation6], 1 }
 0x43a   :  { %1670 = vsyncpa [#allocation9], 1 }
 0x43b   :  { %1671 = vsyncpa [#allocation4], 1 }
 0x43c   :  { %1673 = vsyncpa [#allocation4 + $0x1], 1 }

// kernel: tpu_custom_call.1
= control target key start
LH: loop header
LB: loop body
LE: loop exit
PB: predicated region body
PF: predicated region fallthrough
CT: control target
= control target key end

     0   :  { %s2914_s0 = inlined_call_operand.hbm [shape: s32[3,16,16], index: 0, kind: input, shape index: {}]   ;;  %s2915_s1 = inlined_call_operand.hbm [shape: bf16[3,128,128], index: 1, kind: input, shape index: {}]   ;;  %s2916_s2 = inlined_call_operand.hbm [shape: bf16[128,128], index: 2, kind: input, shape index: {}]   ;;  %s2917_s3 = inlined_call_operand.vmem [shape: f32[1,128], index: 3, kind: input, shape index: {}]   ;;  %s2918_s4 = inlined_call_operand.hbm [shape: bf16[128,128], index: 4, kind: input, shape index: {}]   ;;  %s2919_s5 = inlined_call_operand.vmem [shape: f32[1,128], index: 5, kind: input, shape index: {}]   ;;  %s2920_s6 = inlined_call_operand.hbm [shape: f32[16,128], index: 6, kind: output, shape index: {}]  }
   0x1   :  { %2929 = sst [smem:[#allocation18_spill]] %s2915_s1 }
   0x2   :  { %11 = vsyncpa [#allocation3], 0 }
   0x3   :  { %13 = vsyncpa [#allocation3 + $0x1], 0 }
   0x4   :  { %14 = vsyncpa [#allocation6], 0 }
   0x5   :  { %15 = vsyncpa [#allocation9], 0 }
   0x6   :  { %16 = vsyncpa [#allocation4], 0 }
   0x7   :  { %18 = vsyncpa [#allocation4 + $0x1], 0  ;;  %s2473_s21 = smov 0   ;;  %s2475_s22 = smov 0  }
   0x8   :  { %s2477_s23 = smov 0   ;;  %s2479_s24 = smov 0  }
   0x9 LB: > { %s2494_s25 = sadd.s32 4294967295, %s2423_s24   ;;  %s1747_s26 = sadd.s32 4294967294, %s2423_s24   ;;  %s2423_s24 = sphi %s2479_s24, %s2955_s24   ;;  %s2419_s23 = sphi %s2477_s23, %s2959_s23   ;;  %s2415_s22 = sphi %s2475_s22, %s2958_s22   ;;  %s2411_s21 = sphi %s2473_s21, %s2957_s21  }
   0xa   : > { %s2498_s27 = sadd.s32 1, %s2423_s24   ;;  %s31_s28 = sadd.s32 1, %s2419_s23 }
   0xb   : > { %2930 = sst [smem:[#allocation15_spill]] %s2498_s27  ;;  %s28_s29 = ssub.s32 %s2423_s24, %s2498_s27 }
   0xc   : > { %p38_p0 = scmp.ne.s32.totalorder %s2419_s23, %s2415_s22  ;;  %p29_p1 = scmp.eq.s32.totalorder %s28_s29, 0 }
   0xd   : > { %p39_p2 = scmp.eq.s32.totalorder %s2423_s24, 0  ;;  %p44_p3 = scmp.ne.s32.totalorder %s2415_s22, %s2411_s21 }
   0xe   : > { %p2921_p4 = scmp.eq.s32.totalorder %s2494_s25, 0  ;;  %p173_p7 = scmp.eq.s32.totalorder %s2494_s25, 1 }
   0xf   : > { %s2510_s30 = scalar_select %p29_p1, %s2419_s23, %s31_s28  }
  0x10   : > { %p2512_p5 = por %p39_p2, %p38_p0  ;;  %p2518_p6 = por %p2921_p4, %p44_p3 }
  0x11   : > { %2931 = sst [smem:[#allocation16_spill]] %s2510_s30  ;;  %p179_p8 = scmp.eq.s32.totalorder %s1747_s26, 1 }
  0x12   : > { %s2932_s7 = scalar_select %p2512_p5, 1, 0 }
  0x13   : > { %s2933_s8 = scalar_select %p2518_p6, 1, 0 }
  0x14   : > { %p1748_p9 = scmp.ge.s32.totalorder %s2423_s24, 1  ;;  %p186_p10 = scmp.lt.s32.totalorder %s2423_s24, 3 }
  0x15   : > { %p2525_p11 = por %p173_p7, %p38_p0  ;;  %p2529_p12 = por %p179_p8, %p44_p3 }
  0x16   : > { %p2533_p13 = pnand %p1748_p9, %p186_p10  ;;  %s2425_s12 = smov [#allocation5]  }
  0x17   : > { %s2934_s9 = scalar_select %p2525_p11, 1, 0 }
  0x18   : > { %s2935_s10 = scalar_select %p2529_p12, 1, 0 }
  0x19   : > { %s2937_s11 = scalar_select %p2533_p13, 1, 0 }
  0x1a   : > { %2936 = sst [smem:[#allocation17_spill]] %s2935_s10  ;;  %p2126_p1 = pneg %p2533_p13 }
  0x1b   : > { %s198_s13 = sshll.u32 %s2425_s12, 4  ;;  %s2426_s15 = smov [#allocation7]   ;;  %s199_s13 = int_to_ptr.vmem [resolvable:$true] %s198_s13 }
  0x1c   : > { %p2541_p2 = pnand %p2126_p1, %p2921_p4  ;;  %s211_s16 = sshll.u32 %s2426_s15, 4  ;;  %s212_s16 = int_to_ptr.vmem [resolvable:$true] %s211_s16 }
  0x1d   : > { %s2939_s1 = sld [smem:[#allocation18_spill]] }
  0x1e   : > { %p2555_p8 = pneg %p2541_p2 }
  0x23   : > { %s2235_s19 = scalar_lea.hbm %s2939_s1, 3072 }
  0x24   : > { %p2236_p7 = scmp.ne.s32.totalorder %s2939_s1, %s2235_s19  ;;  %p2242_p1 = scmp.lt.u32.totalorder %s2235_s19, %s2939_s1 }
  0x26   : > { %p2238_p9 = pnand %p2555_p8, %p2236_p7 }
  0x28   : > { %p2239_p10 = pneg %p2238_p9 }
  0x2a   : > { %p2244_p0 = pnand %p2242_p1, %p2239_p10 }
  0x2c   : > { %2247 = shalt.err (!%p2244_p0)
}
  0x2d   : > { %s2248_s15 = scalar_lea.vmem %s199_s13, 3072  ;;  %p2256_p11 = scmp.lt.s32.totalorder %s199_s13, %s199_s13 }
  0x2e   : > { %p2249_p4 = scmp.ne.s32.totalorder %s199_s13, %s2248_s15  ;;  %p2257_p6 = scmp.lt.s32.totalorder %s2248_s15, %s2248_s15 }
  0x30   : > { %p2251_p3 = pnand %p2249_p4, %p2555_p8  ;;  %p2258_p13 = por %p2257_p6, %p2256_p11 }
  0x32   : > { %p2252_p12 = pneg %p2251_p3 }
  0x34   : > { %p2259_p5 = pnand %p2258_p13, %p2252_p12 }
  0x36   : > { %2262 = shalt.err (!%p2259_p5)
}
  0x37   : > { %s2427_s17 = smov 64   ;;  %s2428_s18 = smov 4  }
  0x38   : > { %2129 = dma.hbm_to_vmem [thread:$0]  (!%p2541_p2), %s2939_s1, 3072, %s199_s13, [#allocation6], %s2427_s17, %s2427_s17, %s2428_s18  }
  0x39   : > { %p2941_p4 = scmp.ne.s32.totalorder %s2932_s7, 0  ;;  %p2942_p0 = scmp.lt.s32.totalorder %s2423_s24, 2 }
  0x3a   : > { %s2263_s15 = scalar_lea.hbm %s2916_s2, 1024 }
  0x3b   : > { %p2578_p3 = pnand %p2942_p0, %p2941_p4  ;;  %p2264_p5 = scmp.ne.s32.totalorder %s2916_s2, %s2263_s15 }
  0x3c   : > { %p2270_p12 = scmp.lt.u32.totalorder %s2263_s15, %s2916_s2 }
  0x3d   : > { %s2943_s26 = scalar_select %p2578_p3, 1, 0 }
  0x3e   : > { %p2266_p6 = pnand %p2264_p5, %p2555_p8 }
  0x40   : > { %p2267_p11 = pneg %p2266_p6 }
  0x42   : > { %p2272_p13 = pnand %p2270_p12, %p2267_p11 }
  0x44   : > { %2275 = shalt.err (!%p2272_p13)
}
  0x45   : > { %s2276_s7 = scalar_lea.vmem %s212_s16, 1024  ;;  %p2284_p1 = scmp.lt.s32.totalorder %s212_s16, %s212_s16 }
  0x46   : > { %p2277_p7 = scmp.ne.s32.totalorder %s212_s16, %s2276_s7  ;;  %p2285_p4 = scmp.lt.s32.totalorder %s2276_s7, %s2276_s7 }
  0x48   : > { %p2279_p9 = pnand %p2277_p7, %p2555_p8  ;;  %p2286_p0 = por %p2285_p4, %p2284_p1 }
  0x4a   : > { %p2280_p10 = pneg %p2279_p9 }
  0x4c   : > { %p2287_p3 = pnand %p2286_p0, %p2280_p10 }
  0x4e   : > { %2290 = shalt.err (!%p2287_p3)
}
  0x4f   : > { %2132 = dma.hbm_to_vmem [thread:$0]  (!%p2541_p2), %s2916_s2, 1024, %s212_s16, [#allocation6], %s2427_s17, %s2427_s17, %s2428_s18  }
  0x50   : > { %s2429_s20 = smov [#allocation8]   ;;  %s244_s12 = sand.u32 1, %s2419_s23  }
  0x51   : > { %s227_s29 = sshll.u32 %s2429_s20, 4  ;;  %s2291_s13 = scalar_lea.hbm %s2918_s4, 1024  ;;  %s228_s29 = int_to_ptr.vmem [resolvable:$true] %s227_s29 }
  0x52   : > { %p2292_p3 = scmp.ne.s32.totalorder %s2918_s4, %s2291_s13  ;;  %p2298_p11 = scmp.lt.u32.totalorder %s2291_s13, %s2918_s4 }
  0x54   : > { %p2294_p5 = pnand %p2292_p3, %p2555_p8 }
  0x56   : > { %p2295_p6 = pneg %p2294_p5 }
  0x58   : > { %p2300_p12 = pnand %p2298_p11, %p2295_p6 }
  0x5a   : > { %2303 = shalt.err (!%p2300_p12)
}
  0x5b   : > { %s2304_s16 = scalar_lea.vmem %s228_s29, 1024  ;;  %p2312_p10 = scmp.lt.s32.totalorder %s228_s29, %s228_s29 }
  0x5c   : > { %p2305_p13 = scmp.ne.s32.totalorder %s228_s29, %s2304_s16  ;;  %p2313_p1 = scmp.lt.s32.totalorder %s2304_s16, %s2304_s16 }
  0x5e   : > { %p2307_p7 = pnand %p2305_p13, %p2555_p8  ;;  %p2314_p4 = por %p2313_p1, %p2312_p10 }
  0x60   : > { %p2308_p9 = pneg %p2307_p7 }
  0x62   : > { %p2315_p0 = pnand %p2314_p4, %p2308_p9 }
  0x64   : > { %2318 = shalt.err (!%p2315_p0)
}
  0x65   : > { %2135 = dma.hbm_to_vmem [thread:$0]  (!%p2541_p2), %s2918_s4, 1024, %s228_s29, [#allocation9], %s2427_s17, %s2427_s17, %s2428_s18  }
  0x66   : > { %s2108_s28 = smul.u32 24, %s244_s12  ;;  %s1753_s30 = sshll.u32 %s2423_s24, 7 }
  0x67   : > { %s2629_s19 = scalar_lea.hbm %s2914_s0, %s1753_s30  ;;  %s2633_s7 = scalar_lea.sflag [#allocation3], %s244_s12 }
  0x68   : > { %s248_s14 = scalar_lea.vmem [#allocation2], %s2108_s28  ;;  %s2319_s27 = scalar_lea.hbm %s2629_s19, 384 }
  0x69   : > { %s254_s13 = sshll.u32 %s248_s14, 4  ;;  %p2320_p8 = scmp.ne.s32.totalorder %s2629_s19, %s2319_s27  ;;  %s2631_s13 = int_to_ptr.vmem [resolvable:$true] %s254_s13 }
  0x6a   : > { %p2944_p2 = scmp.ne.s32.totalorder %s2943_s26, 0  ;;  %s2324_s29 = scalar_lea.hbm %s2914_s0, 768 }
  0x6b   : > { %p2325_p11 = scmp.lt.u32.totalorder %s2629_s19, %s2914_s0  ;;  %p2326_p12 = scmp.lt.u32.totalorder %s2324_s29, %s2319_s27 }
  0x6c   : > { %p2321_p3 = pneg %p2944_p2  ;;  %p2328_p7 = scmp.lt.u32.totalorder %s2319_s27, %s2629_s19 }
  0x6d   : > { %p2327_p13 = por %p2326_p12, %p2325_p11 }
  0x6e   : > { %p2322_p5 = pnand %p2321_p3, %p2320_p8 }
  0x6f   : > { %p2329_p9 = por %p2328_p7, %p2327_p13 }
  0x70   : > { %p2323_p6 = pneg %p2322_p5 }
  0x72   : > { %p2330_p10 = pnand %p2329_p9, %p2323_p6 }
  0x74   : > { %2333 = shalt.err (!%p2330_p10)
}
  0x75   : > { %s2334_s12 = scalar_lea.vmem %s2631_s13, 384  ;;  %s2430_s10 = smov [#allocation2]  }
  0x76   : > { %p2335_p1 = scmp.ne.s32.totalorder %s2631_s13, %s2334_s12  ;;  %s2339_s28 = sshll.u32 %s2430_s10, 4  ;;  %s2340_s28 = int_to_ptr.vmem [resolvable:$false] %s2339_s28 }
  0x77   : > { %s2341_s30 = scalar_lea.vmem %s2340_s28, 768  ;;  %p2342_p8 = scmp.lt.s32.totalorder %s2631_s13, %s2340_s28 }
  0x78   : > { %p2337_p4 = pnand %p2335_p1, %p2321_p3  ;;  %p2343_p5 = scmp.lt.s32.totalorder %s2341_s30, %s2334_s12 }
  0x7a   : > { %p2338_p0 = pneg %p2337_p4  ;;  %p2344_p11 = por %p2343_p5, %p2342_p8 }
  0x7c   : > { %p2345_p12 = pnand %p2344_p11, %p2338_p0 }
  0x7e   : > { %2348 = shalt.err (!%p2345_p12)
}
  0x7f   : > { %s2431_s20 = smov 256   ;;  %s2432_s15 = smov 128  }
  0x80   : > { %s2433_s14 = smov 8   ;;  %p2945_p3 = scmp.ne.s32.totalorder %s2937_s11, 0 }
  0x81   : > { %2139 = dma.hbm_to_vmem [thread:$0]  (!%p2944_p2), %s2629_s19, 384, %s2631_s13, %s2633_s7, %s2431_s20, %s2432_s15, %s2433_s14  }
  0x82   : > { %266 = sbr.rel (%p2945_p3) target bundleno = 1053 (0x41d), region = 44  ;;  %s2664_s27 = sand.u32 (!%p2945_p3), 1, %s2415_s22  }
  0x83   : > { %s2109_s17 = smul.u32 (!%p2945_p3), 24, %s2664_s27  ;;  %s269_s18 = scalar_lea.sflag (!%p2945_p3), [#allocation3], %s2664_s27 }
  0x84   : > { %p2946_p6 = scmp.ne.s32.totalorder (!%p2945_p3), %s2933_s8, 0 }
  0x85   : > { %s2668_s29 = scalar_lea.vmem (!%p2945_p3), [#allocation2], %s2109_s17 }
  0x89   : > { %2394 = dma.done.wait (%p2946_p6), %s269_s18, 384  }
  0x8a   : > { %2396 = vsyncadd (%p2946_p6), %s269_s18, 4294966912  ;;  %p2947_p2 = scmp.eq.s32.totalorder %s2494_s25, 0 }
  0x8c   : > { %2398 = dma.done.wait (%p2947_p2), [#allocation6], 4096   ;;  %p2948_p13 = pmov %p2947_p2 }
  0x8d   : > { %p2949_p7 = pmov %p2947_p2 }
  0x8e   : > { %2400 = vsyncadd (%p2948_p13), [#allocation6], 4294963200 }
  0x8f   : > { %2402 = dma.done.wait (%p2949_p7), [#allocation9], 1024   ;;  %p2950_p9 = pmov %p2947_p2 }
  0x90   : > { %v315_v0 = vlaneseq  ;;  %v2692_v4 = vld [vmem:[%s2668_s29] sm:$0xff]  ;;  %v2195_v7 = vld [vmem:[#allocation5] sm:$0xff]   ;;  %v2198_v13 = vld [vmem:[#allocation5 + $0x18] sm:$0xff]   ;;  %v2434_v61 = vmov 1.0|1.0   ;;  %s1758_s26 = sshll.u32 %s2664_s27, 3 }
  0x91   : > { %2404 = vsyncadd (%p2950_p9), [#allocation9], 4294966272  ;;  %v2196_v9 = vld [vmem:[#allocation5 + $0x8] sm:$0xff]   ;;  %1960 = vmatprep.subr.bf16.mxu0 %v2195_v7  ;;  %v2197_v10 = vld [vmem:[#allocation5 + $0x10] sm:$0xff]   ;;  %s1852_s7 = sshll.u32 %s2494_s25, 7  ;;  %s312_s16 = scalar_lea.vmem [#allocation10], %s1758_s26 }
  0x92   : > { %v2683_v1 = vshrl.u32 %v315_v0, 7  ;;  %1961 = vmatpush3.bf16.msra.mxu0 %v2195_v7  ;;  %v2203_v14 = vld [vmem:[#allocation5 + $0x40] sm:$0xff]   ;;  %v2204_v17 = vld [vmem:[#allocation5 + $0x48] sm:$0xff]   ;;  %v2206_v19 = vld [vmem:[#allocation5 + $0x50] sm:$0xff]   ;;  %v2753_v57 = vand.u32 127, %v315_v0  ;;  %s1648_s1 = sshll.u32 %s312_s16, 4  ;;  %s2870_s28 = scalar_lea.hbm %s2920_s6, %s1852_s7  ;;  %s2872_s1 = int_to_ptr.vmem [resolvable:$true] %s1648_s1 }
  0x93   : > { %1962 = vmatprep.subr.bf16.mxu0 %v2196_v9  ;;  %1928 = vmatprep.subr.bf16.mxu1 %v2203_v14  ;;  %v2199_v18 = vld [vmem:[#allocation5 + $0x20] sm:$0xff]   ;;  %v2200_v22 = vld [vmem:[#allocation5 + $0x28] sm:$0xff]   ;;  %v2208_v23 = vld [vmem:[#allocation5 + $0x58] sm:$0xff]   ;;  %s1635_s30 = scalar_lea.sflag [#allocation4], %s2664_s27  ;;  %s2349_s25 = scalar_lea.vmem %s2872_s1, 128 }
  0x94   : > { %v2686_v2 = vsub.s32 1, %v2683_v1  ;;  %v2689_v3 = vsub.s32 0, %v2683_v1  ;;  %v2699_v8 = vsub.s32 2, %v2683_v1  ;;  %v2704_v12 = vsub.s32 3, %v2683_v1  ;;  %1929 = vmatpush3.bf16.msra.mxu1 %v2203_v14  ;;  %v2201_v26 = vld [vmem:[#allocation5 + $0x30] sm:$0xff]   ;;  %v2210_v27 = vld [vmem:[#allocation5 + $0x60] sm:$0xff]   ;;  %p2350_p10 = scmp.ne.s32.totalorder %s2872_s1, %s2349_s25 }
  0x95   : > { %v2709_v16 = vsub.s32 4, %v2683_v1  ;;  %1930 = vmatprep.subr.bf16.mxu1 %v2204_v17  ;;  %v2714_v21 = vsub.s32 5, %v2683_v1  ;;  %v2719_v25 = vsub.s32 6, %v2683_v1  ;;  %v2724_v29 = vsub.s32 7, %v2683_v1  ;;  %v2202_v30 = vld [vmem:[#allocation5 + $0x38] sm:$0xff]   ;;  %v2212_v31 = vld [vmem:[#allocation5 + $0x68] sm:$0xff]  }
  0x96   : > { %v331_v5 = vrot.slane %v2692_v4, %v2686_v2  ;;  %v320_v6 = vrot.slane %v2692_v4, %v2689_v3  ;;  %v342_v11 = vrot.slane %v2692_v4, %v2699_v8  ;;  %1963 = vmatpush3.bf16.msra.mxu0 %v2196_v9  ;;  %v353_v15 = vrot.slane %v2692_v4, %v2704_v12  ;;  %v1759_v33 = vld [vmem:[%s2668_s29 + $0x8] sm:$0xff]  ;;  %v2729_v34 = vld [vmem:[#allocation5 + $0x80] sm:$0xff]   ;;  %v2207_v60 = vld [vmem:[#allocation5 + $0x88] sm:$0xff]   ;;  %p2951_p1 = scmp.ne.s32.totalorder %s2934_s9, 0  ;;  %s2437_s20 = smov [#allocation10]  }
  0x97   : > { %1964 = vmatprep.subr.bf16.mxu0 %v2197_v10  ;;  %v364_v20 = vrot.slane %v2692_v4, %v2709_v16  ;;  %v375_v24 = vrot.slane %v2692_v4, %v2714_v21  ;;  %v386_v28 = vrot.slane %v2692_v4, %v2719_v25  ;;  %v397_v32 = vrot.slane %v2692_v4, %v2724_v29  ;;  %v2214_v35 = vld [vmem:[#allocation5 + $0x70] sm:$0xff]   ;;  %v1808_v37 = vld [vmem:[%s2668_s29 + $0x10] sm:$0xff]  ;;  %s2353_s15 = sshll.u32 %s2437_s20, 4  ;;  %s2354_s15 = int_to_ptr.vmem [resolvable:$false] %s2353_s15 }
  0x98   : > { %333 = vbcast.lane.b32.xlu1 %v331_v5, 256  ;;  %322 = vbcast.lane.b32.xlu0 %v320_v6, 256  ;;  %v466_v36 = vrot.slane %v1759_v33, %v2689_v3  ;;  %v2216_v38 = vld [vmem:[#allocation5 + $0x78] sm:$0xff]   ;;  %v903_v39 = vrot.slane %v1808_v37, %v2689_v3  ;;  %v477_v40 = vrot.slane %v1759_v33, %v2686_v2  ;;  %v2747_v52 = vld [vmem:[#allocation7] sm:$0xff]   ;;  %v2209_v0 = vld [vmem:[#allocation5 + $0x90] sm:$0xff]   ;;  %p2351_p4 = pnand %p2350_p10, %p2951_p1  ;;  %s2355_s14 = scalar_lea.vmem %s2354_s15, 256 }
  0x99   : > { %1931 = vmatpush3.bf16.msra.mxu1 %v2204_v17  ;;  %v914_v41 = vrot.slane %v1808_v37, %v2686_v2  ;;  %v488_v42 = vrot.slane %v1759_v33, %v2699_v8  ;;  %v925_v43 = vrot.slane %v1808_v37, %v2699_v8  ;;  %v499_v44 = vrot.slane %v1759_v33, %v2704_v12  ;;  %v2211_v4 = vld [vmem:[#allocation5 + $0x98] sm:$0xff]   ;;  %v2213_v7 = vld [vmem:[#allocation5 + $0xa0] sm:$0xff]   ;;  %p2356_p8 = scmp.lt.s32.totalorder %s2872_s1, %s2354_s15  ;;  %p2357_p5 = scmp.lt.s32.totalorder %s2355_s14, %s2349_s25 }
  0x9a   : > { %1965 = vmatpush3.bf16.msra.mxu0 %v2197_v10  ;;  %1932 = vmatprep.subr.bf16.mxu1 %v2206_v19  ;;  %v936_v45 = vrot.slane %v1808_v37, %v2704_v12  ;;  %v510_v46 = vrot.slane %v1759_v33, %v2709_v16  ;;  %v947_v47 = vrot.slane %v1808_v37, %v2709_v16  ;;  %v2215_v10 = vld [vmem:[#allocation5 + $0xa8] sm:$0xff]   ;;  %v2218_v16 = vld [vmem:[#allocation5 + $0xb8] sm:$0xff]   ;;  %p2352_p0 = pneg %p2351_p4 }
  0x9b   : > { %1966 = vmatprep.subr.bf16.mxu0 %v2198_v13  ;;  %v521_v48 = vrot.slane %v1759_v33, %v2714_v21  ;;  %v958_v49 = vrot.slane %v1808_v37, %v2714_v21  ;;  %v532_v50 = vrot.slane %v1759_v33, %v2719_v25  ;;  %v969_v51 = vrot.slane %v1808_v37, %v2719_v25  ;;  %p2358_p11 = por %p2357_p5, %p2356_p8 }
  0x9c   : > { %337 = vbcast.lane.b32.xlu1 %v331_v5, 264  ;;  %326 = vbcast.lane.b32.xlu0 %v320_v6, 264  ;;  %v543_v53 = vrot.slane %v1759_v33, %v2724_v29  ;;  %v980_v54 = vrot.slane %v1808_v37, %v2724_v29  ;;  %v2222_v29 = vld [vmem:[#allocation7 + $0x18] sm:$0xff]  }
  0x9d   : > { %1933 = vmatpush3.bf16.msra.mxu1 %v2206_v19  ;;  %p2359_p12 = pnand %p2358_p11, %p2352_p0 }
  0x9e   : > { %1967 = vmatpush3.bf16.msra.mxu0 %v2198_v13  ;;  %1934 = vmatprep.subr.bf16.mxu1 %v2208_v23  ;;  %v2217_v13 = vld [vmem:[#allocation5 + $0xb0] sm:$0xff]  }
  0x9f   : > { %1968 = vmatprep.subr.bf16.mxu0 %v2199_v18 }
  0xa0   : > { %348 = vbcast.lane.b32.xlu1 %v342_v11, 264  ;;  %344 = vbcast.lane.b32.xlu0 %v342_v11, 256 }
  0xa1   : > { %1935 = vmatpush3.bf16.msra.mxu1 %v2208_v23  ;;  %v2220_v23 = vld [vmem:[#allocation7 + $0x8] sm:$0xff]  }
  0xa2   : > { %1969 = vmatpush3.bf16.msra.mxu0 %v2199_v18  ;;  %1936 = vmatprep.subr.bf16.mxu1 %v2210_v27 }
  0xa3   : > { %1970 = vmatprep.subr.bf16.mxu0 %v2200_v22 }
  0xa4   : > { %359 = vbcast.lane.b32.xlu1 %v353_v15, 264  ;;  %355 = vbcast.lane.b32.xlu0 %v353_v15, 256 }
  0xa5   : > { %1937 = vmatpush3.bf16.msra.mxu1 %v2210_v27 }
  0xa6   : > { %1971 = vmatpush3.bf16.msra.mxu0 %v2200_v22  ;;  %1938 = vmatprep.subr.bf16.mxu1 %v2212_v31 }
  0xa7   : > { %1972 = vmatprep.subr.bf16.mxu0 %v2201_v26 }
  0xa8   : > { %370 = vbcast.lane.b32.xlu1 %v364_v20, 264  ;;  %366 = vbcast.lane.b32.xlu0 %v364_v20, 256 }
  0xa9   : > { %1939 = vmatpush3.bf16.msra.mxu1 %v2212_v31 }
  0xaa   : > { %1973 = vmatpush3.bf16.msra.mxu0 %v2201_v26  ;;  %1940 = vmatprep.subr.bf16.mxu1 %v2214_v35  ;;  %v2221_v26 = vld [vmem:[#allocation7 + $0x10] sm:$0xff]  }
  0xab   : > { %1974 = vmatprep.subr.bf16.mxu0 %v2202_v30 }
  0xac   : > { %381 = vbcast.lane.b32.xlu1 %v375_v24, 264  ;;  %377 = vbcast.lane.b32.xlu0 %v375_v24, 256 }
  0xad   : > { %1941 = vmatpush3.bf16.msra.mxu1 %v2214_v35 }
  0xae   : > { %1975 = vmatpush3.bf16.msra.mxu0 %v2202_v30  ;;  %1942 = vmatprep.subr.bf16.mxu1 %v2216_v38 }
  0xaf   : > { %1992 = vmatprep.subr.bf16.mxu0 %v2729_v34 }
  0xb0   : > { %392 = vbcast.lane.b32.xlu1 %v386_v28, 264  ;;  %388 = vbcast.lane.b32.xlu0 %v386_v28, 256 }
  0xb1   : > { %1943 = vmatpush3.bf16.msra.mxu1 %v2216_v38 }
  0xb2   : > { %2024 = vmatprep.subr.bf16.mxu1 %v2747_v52 }
  0xb4   : > { %403 = vbcast.lane.b32.xlu1 %v397_v32, 264  ;;  %399 = vbcast.lane.b32.xlu0 %v397_v32, 256  ;;  %v2223_v32 = vld [vmem:[#allocation7 + $0x20] sm:$0xff]  }
  0xb8   : > { %472 = vbcast.lane.b32.xlu1 %v466_v36, 264  ;;  %468 = vbcast.lane.b32.xlu0 %v466_v36, 256 }
  0xbc   : > { %909 = vbcast.lane.b32.xlu1 %v903_v39, 264  ;;  %905 = vbcast.lane.b32.xlu0 %v903_v39, 256 }
  0xc0   : > { %483 = vbcast.lane.b32.xlu1 %v477_v40, 264  ;;  %479 = vbcast.lane.b32.xlu0 %v477_v40, 256 }
  0xc4   : > { %920 = vbcast.lane.b32.xlu1 %v914_v41, 264  ;;  %916 = vbcast.lane.b32.xlu0 %v914_v41, 256 }
  0xc8   : > { %494 = vbcast.lane.b32.xlu1 %v488_v42, 264  ;;  %490 = vbcast.lane.b32.xlu0 %v488_v42, 256 }
  0xcc   : > { %931 = vbcast.lane.b32.xlu1 %v925_v43, 264  ;;  %927 = vbcast.lane.b32.xlu0 %v925_v43, 256 }
  0xd0   : > { %505 = vbcast.lane.b32.xlu1 %v499_v44, 264  ;;  %501 = vbcast.lane.b32.xlu0 %v499_v44, 256 }
  0xd4   : > { %942 = vbcast.lane.b32.xlu1 %v936_v45, 264  ;;  %938 = vbcast.lane.b32.xlu0 %v936_v45, 256 }
  0xd8   : > { %516 = vbcast.lane.b32.xlu1 %v510_v46, 264  ;;  %512 = vbcast.lane.b32.xlu0 %v510_v46, 256 }
  0xdc   : > { %953 = vbcast.lane.b32.xlu1 %v947_v47, 264  ;;  %949 = vbcast.lane.b32.xlu0 %v947_v47, 256 }
  0xe0   : > { %527 = vbcast.lane.b32.xlu1 %v521_v48, 264  ;;  %523 = vbcast.lane.b32.xlu0 %v521_v48, 256 }
  0xe4   : > { %964 = vbcast.lane.b32.xlu1 %v958_v49, 264  ;;  %960 = vbcast.lane.b32.xlu0 %v958_v49, 256 }
  0xe8   : > { %538 = vbcast.lane.b32.xlu1 %v532_v50, 264  ;;  %534 = vbcast.lane.b32.xlu0 %v532_v50, 256 }
  0xec   : > { %975 = vbcast.lane.b32.xlu1 %v969_v51, 264  ;;  %971 = vbcast.lane.b32.xlu0 %v969_v51, 256 }
  0xf0   : > { %549 = vbcast.lane.b32.xlu1 %v543_v53, 264  ;;  %545 = vbcast.lane.b32.xlu0 %v543_v53, 256  ;;  %v2224_v53 = vld [vmem:[#allocation7 + $0x28] sm:$0xff]  }
  0xf4   : > { %986 = vbcast.lane.b32.xlu1 %v980_v54, 264  ;;  %982 = vbcast.lane.b32.xlu0 %v980_v54, 256  ;;  %v2225_v54 = vld [vmem:[#allocation7 + $0x30] sm:$0xff]  }
 0x10a   : > { %v334_v55 = vpop.permute.xlu1 %333  ;;  %v323_v56 = vpop.permute.xlu0 %322 }
 0x10b   : > { %vm407_vm0 = vcmp.eq.s32.totalorder %v334_v55, %v2753_v57  ;;  %vm405_vm3 = vcmp.eq.s32.totalorder %v323_v56, %v2753_v57  ;;  %v2226_v55 = vld [vmem:[#allocation7 + $0x38] sm:$0xff]  }
 0x10e   : > { %v338_v58 = vpop.permute.xlu1 %337  ;;  %v327_v59 = vpop.permute.xlu0 %326 }
 0x10f   : > { %vm408_vm1 = vcmp.eq.s32.totalorder %v338_v58, %v2753_v57  ;;  %vm406_vm2 = vcmp.eq.s32.totalorder %v327_v59, %v2753_v57 }
 0x110   : > { %vm1794_vm4 = vmpackc.low %vm408_vm1, %vm407_vm0 }
 0x111   : > { %vm1792_vm5 = vmpackc.low %vm406_vm2, %vm405_vm3 }
 0x112   : > { %1976 = vmatprep.mubr.msk.bf16.mxu0 %vm1792_vm5, %v2434_v61  ;;  %v349_v62 = vpop.permute.xlu1 %348  ;;  %v345_v63 = vpop.permute.xlu0 %344 }
 0x113   : > { %vm410_vm6 = vcmp.eq.s32.totalorder %v349_v62, %v2753_v57  ;;  %1977 = vmatmul.mubr.msk.bf16.vlgmr.msra.gmra.mrb[0].mxu0 %vm1794_vm4, %v2434_v61  ;;  %vm409_vm7 = vcmp.eq.s32.totalorder %v345_v63, %v2753_v57 }
 0x114   : > { %vm1796_vm8 = vmpackc.low %vm410_vm6, %vm409_vm7  ;;  %1993 = vmatpush3.bf16.msra.mxu0 %v2729_v34 }
 0x115   : > { %1980 = vmatprep.mubr.msk.bf16.mxu0 %vm1796_vm8, %v2434_v61  ;;  %1994 = vmatprep.subr.bf16.mxu0 %v2207_v60 }
 0x116   : > { %v360_v2 = vpop.permute.xlu1 %359  ;;  %v356_v3 = vpop.permute.xlu0 %355 }
 0x117   : > { %vm412_vm9 = vcmp.eq.s32.totalorder %v360_v2, %v2753_v57  ;;  %vm411_vm10 = vcmp.eq.s32.totalorder %v356_v3, %v2753_v57 }
 0x118   : > { %vm1798_vm11 = vmpackc.low %vm412_vm9, %vm411_vm10  ;;  %1995 = vmatpush3.bf16.msra.mxu0 %v2207_v60 }
 0x119   : > { %1996 = vmatprep.subr.bf16.mxu0 %v2209_v0 }
 0x11a   : > { %v371_v5 = vpop.permute.xlu1 %370  ;;  %v367_v6 = vpop.permute.xlu0 %366 }
 0x11b   : > { %vm414_vm12 = vcmp.eq.s32.totalorder %v371_v5, %v2753_v57  ;;  %1981 = vmatmul.mubr.msk.bf16.gmra.mrb[4].mxu0 %vm1798_vm11, %v2434_v61  ;;  %vm413_vm13 = vcmp.eq.s32.totalorder %v367_v6, %v2753_v57 }
 0x11c   : > { %vm1800_vm14 = vmpackc.low %vm414_vm12, %vm413_vm13  ;;  %1997 = vmatpush3.bf16.msra.mxu0 %v2209_v0 }
 0x11d   : > { %1984 = vmatprep.mubr.msk.bf16.mxu0 %vm1800_vm14, %v2434_v61  ;;  %1998 = vmatprep.subr.bf16.mxu0 %v2211_v4 }
 0x11e   : > { %v382_v8 = vpop.permute.xlu1 %381  ;;  %v378_v9 = vpop.permute.xlu0 %377 }
 0x11f   : > { %vm416_vm15 = vcmp.eq.s32.totalorder %v382_v8, %v2753_v57  ;;  %vm415_vm0 = vcmp.eq.s32.totalorder %v378_v9, %v2753_v57 }
 0x120   : > { %vm1802_vm1 = vmpackc.low %vm416_vm15, %vm415_vm0  ;;  %1999 = vmatpush3.bf16.msra.mxu0 %v2211_v4 }
 0x121   : > { %2000 = vmatprep.subr.bf16.mxu0 %v2213_v7 }
 0x122   : > { %v393_v11 = vpop.permute.xlu1 %392  ;;  %v389_v12 = vpop.permute.xlu0 %388 }
 0x123   : > { %vm418_vm2 = vcmp.eq.s32.totalorder %v393_v11, %v2753_v57  ;;  %1985 = vmatmul.mubr.msk.bf16.gmra.mrb[8].mxu0 %vm1802_vm1, %v2434_v61  ;;  %vm417_vm3 = vcmp.eq.s32.totalorder %v389_v12, %v2753_v57 }
 0x124   : > { %vm1804_vm4 = vmpackc.low %vm418_vm2, %vm417_vm3  ;;  %2001 = vmatpush3.bf16.msra.mxu0 %v2213_v7 }
 0x125   : > { %1988 = vmatprep.mubr.msk.bf16.mxu0 %vm1804_vm4, %v2434_v61  ;;  %2002 = vmatprep.subr.bf16.mxu0 %v2215_v10 }
 0x126   : > { %v404_v14 = vpop.permute.xlu1 %403  ;;  %v400_v15 = vpop.permute.xlu0 %399 }
 0x127   : > { %vm420_vm5 = vcmp.eq.s32.totalorder %v404_v14, %v2753_v57  ;;  %vm419_vm6 = vcmp.eq.s32.totalorder %v400_v15, %v2753_v57 }
 0x128   : > { %vm1806_vm7 = vmpackc.low %vm420_vm5, %vm419_vm6  ;;  %2003 = vmatpush3.bf16.msra.mxu0 %v2215_v10 }
 0x129   : > { %2004 = vmatprep.subr.bf16.mxu0 %v2217_v13 }
 0x12a   : > { %v473_v17 = vpop.permute.xlu1 %472  ;;  %v469_v18 = vpop.permute.xlu0 %468 }
 0x12b   : > { %vm552_vm8 = vcmp.eq.s32.totalorder %v473_v17, %v2753_v57  ;;  %1989 = vmatmul.mubr.msk.bf16.gmra.mrb[12].mxu0 %vm1806_vm7, %v2434_v61  ;;  %vm551_vm9 = vcmp.eq.s32.totalorder %v469_v18, %v2753_v57 }
 0x12c   : > { %vm1768_vm10 = vmpackc.low %vm552_vm8, %vm551_vm9  ;;  %2005 = vmatpush3.bf16.msra.mxu0 %v2217_v13 }
 0x12d   : > { %1944 = vmatprep.mubr.msk.bf16.mxu1 %vm1768_vm10, %v2434_v61  ;;  %2006 = vmatprep.subr.bf16.mxu0 %v2218_v16 }
 0x12e   : > { %v910_v19 = vpop.permute.xlu1 %909  ;;  %v906_v20 = vpop.permute.xlu0 %905 }
 0x12f   : > { %vm989_vm11 = vcmp.eq.s32.totalorder %v910_v19, %v2753_v57  ;;  %vm988_vm12 = vcmp.eq.s32.totalorder %v906_v20, %v2753_v57 }
 0x130   : > { %vm1817_vm13 = vmpackc.low %vm989_vm11, %vm988_vm12  ;;  %2007 = vmatpush3.bf16.msra.mxu0 %v2218_v16 }
 0x131   : > { %2008 = vmatprep.mubr.msk.bf16.mxu0 %vm1817_vm13, %v2434_v61 }
 0x132   : > { %v484_v21 = vpop.permute.xlu1 %483  ;;  %v480_v22 = vpop.permute.xlu0 %479 }
 0x133   : > { %vm554_vm14 = vcmp.eq.s32.totalorder %v484_v21, %v2753_v57  ;;  %vm553_vm15 = vcmp.eq.s32.totalorder %v480_v22, %v2753_v57 }
 0x134   : > { %vm1770_vm0 = vmpackc.low %vm554_vm14, %vm553_vm15 }
 0x135   : > { %1945 = vmatmul.mubr.msk.bf16.vlgmr.msra.gmra.mrb[0].mxu1 %vm1770_vm0, %v2434_v61 }
 0x136   : > { %v921_v24 = vpop.permute.xlu1 %920  ;;  %v917_v25 = vpop.permute.xlu0 %916  ;;  %2025 = vmatpush3.bf16.msra.mxu1 %v2747_v52 }
 0x137   : > { %vm991_vm1 = vcmp.eq.s32.totalorder %v921_v24, %v2753_v57  ;;  %vm990_vm2 = vcmp.eq.s32.totalorder %v917_v25, %v2753_v57  ;;  %2026 = vmatprep.subr.bf16.mxu1 %v2220_v23 }
 0x138   : > { %vm1819_vm3 = vmpackc.low %vm991_vm1, %vm990_vm2 }
 0x139   : > { %2009 = vmatmul.mubr.msk.bf16.vlgmr.msra.gmra.mrb[0].mxu0 %vm1819_vm3, %v2434_v61 }
 0x13a   : > { %v495_v27 = vpop.permute.xlu1 %494  ;;  %v491_v28 = vpop.permute.xlu0 %490  ;;  %2027 = vmatpush3.bf16.msra.mxu1 %v2220_v23 }
 0x13b   : > { %vm556_vm4 = vcmp.eq.s32.totalorder %v495_v27, %v2753_v57  ;;  %vm555_vm5 = vcmp.eq.s32.totalorder %v491_v28, %v2753_v57  ;;  %2028 = vmatprep.subr.bf16.mxu1 %v2221_v26 }
 0x13c   : > { %vm1772_vm6 = vmpackc.low %vm556_vm4, %vm555_vm5 }
 0x13d   : > { %1948 = vmatprep.mubr.msk.bf16.mxu1 %vm1772_vm6, %v2434_v61 }
 0x13e   : > { %v932_v30 = vpop.permute.xlu1 %931  ;;  %v928_v31 = vpop.permute.xlu0 %927  ;;  %2029 = vmatpush3.bf16.msra.mxu1 %v2221_v26 }
 0x13f   : > { %vm993_vm7 = vcmp.eq.s32.totalorder %v932_v30, %v2753_v57  ;;  %vm992_vm8 = vcmp.eq.s32.totalorder %v928_v31, %v2753_v57  ;;  %2030 = vmatprep.subr.bf16.mxu1 %v2222_v29 }
 0x140   : > { %vm1821_vm9 = vmpackc.low %vm993_vm7, %vm992_vm8 }
 0x141   : > { %2012 = vmatprep.mubr.msk.bf16.mxu0 %vm1821_vm9, %v2434_v61 }
 0x142   : > { %v506_v33 = vpop.permute.xlu1 %505  ;;  %v502_v34 = vpop.permute.xlu0 %501  ;;  %2031 = vmatpush3.bf16.msra.mxu1 %v2222_v29 }
 0x143   : > { %vm558_vm10 = vcmp.eq.s32.totalorder %v506_v33, %v2753_v57  ;;  %vm557_vm11 = vcmp.eq.s32.totalorder %v502_v34, %v2753_v57  ;;  %2032 = vmatprep.subr.bf16.mxu1 %v2223_v32 }
 0x144   : > { %vm1774_vm12 = vmpackc.low %vm558_vm10, %vm557_vm11 }
 0x145   : > { %1949 = vmatmul.mubr.msk.bf16.gmra.mrb[4].mxu1 %vm1774_vm12, %v2434_v61 }
 0x146   : > { %v943_v35 = vpop.permute.xlu1 %942  ;;  %v939_v36 = vpop.permute.xlu0 %938  ;;  %2033 = vmatpush3.bf16.msra.mxu1 %v2223_v32 }
 0x147   : > { %vm995_vm13 = vcmp.eq.s32.totalorder %v943_v35, %v2753_v57  ;;  %vm994_vm14 = vcmp.eq.s32.totalorder %v939_v36, %v2753_v57  ;;  %2034 = vmatprep.subr.bf16.mxu1 %v2224_v53 }
 0x148   : > { %vm1823_vm15 = vmpackc.low %vm995_vm13, %vm994_vm14 }
 0x149   : > { %2013 = vmatmul.mubr.msk.bf16.gmra.mrb[4].mxu0 %vm1823_vm15, %v2434_v61 }
 0x14a   : > { %v517_v37 = vpop.permute.xlu1 %516  ;;  %v513_v38 = vpop.permute.xlu0 %512  ;;  %2035 = vmatpush3.bf16.msra.mxu1 %v2224_v53  ;;  %v2230_v53 = vld [vmem:[#allocation8 + $0x18] sm:$0xff]  }
 0x14b   : > { %vm560_vm0 = vcmp.eq.s32.totalorder %v517_v37, %v2753_v57  ;;  %vm559_vm1 = vcmp.eq.s32.totalorder %v513_v38, %v2753_v57  ;;  %2036 = vmatprep.subr.bf16.mxu1 %v2225_v54 }
 0x14c   : > { %vm1776_vm2 = vmpackc.low %vm560_vm0, %vm559_vm1 }
 0x14d   : > { %1952 = vmatprep.mubr.msk.bf16.mxu1 %vm1776_vm2, %v2434_v61 }
 0x14e   : > { %v954_v39 = vpop.permute.xlu1 %953  ;;  %v950_v40 = vpop.permute.xlu0 %949  ;;  %2037 = vmatpush3.bf16.msra.mxu1 %v2225_v54  ;;  %v2231_v54 = vld [vmem:[#allocation8 + $0x20] sm:$0xff]  }
 0x14f   : > { %vm997_vm3 = vcmp.eq.s32.totalorder %v954_v39, %v2753_v57  ;;  %vm996_vm4 = vcmp.eq.s32.totalorder %v950_v40, %v2753_v57  ;;  %2038 = vmatprep.subr.bf16.mxu1 %v2226_v55 }
 0x150   : > { %vm1825_vm5 = vmpackc.low %vm997_vm3, %vm996_vm4 }
 0x151   : > { %2016 = vmatprep.mubr.msk.bf16.mxu0 %vm1825_vm5, %v2434_v61 }
 0x152   : > { %v528_v41 = vpop.permute.xlu1 %527  ;;  %v524_v42 = vpop.permute.xlu0 %523  ;;  %2039 = vmatpush3.bf16.msra.mxu1 %v2226_v55  ;;  %v2232_v55 = vld [vmem:[#allocation8 + $0x28] sm:$0xff]  }
 0x153   : > { %vm562_vm6 = vcmp.eq.s32.totalorder %v528_v41, %v2753_v57  ;;  %vm561_vm7 = vcmp.eq.s32.totalorder %v524_v42, %v2753_v57 }
 0x154   : > { %vm1778_vm8 = vmpackc.low %vm562_vm6, %vm561_vm7 }
 0x155   : > { %1953 = vmatmul.mubr.msk.bf16.gmra.mrb[8].mxu1 %vm1778_vm8, %v2434_v61  ;;  %vm2436_vm8 = vmmov 0  }
 0x156   : > { %v965_v43 = vpop.permute.xlu1 %964  ;;  %v961_v44 = vpop.permute.xlu0 %960 }
 0x157   : > { %vm999_vm9 = vcmp.eq.s32.totalorder %v965_v43, %v2753_v57  ;;  %vm998_vm10 = vcmp.eq.s32.totalorder %v961_v44, %v2753_v57 }
 0x158   : > { %vm1827_vm11 = vmpackc.low %vm999_vm9, %vm998_vm10  ;;  %vm1523_vm10 = vcmask 1041409  }
 0x159   : > { %2017 = vmatmul.mubr.msk.bf16.gmra.mrb[8].mxu0 %vm1827_vm11, %v2434_v61  ;;  %vm1526_vm11 = vcmask 1042434  }
 0x15a   : > { %v539_v45 = vpop.permute.xlu1 %538  ;;  %v535_v46 = vpop.permute.xlu0 %534 }
 0x15b   : > { %vm564_vm12 = vcmp.eq.s32.totalorder %v539_v45, %v2753_v57  ;;  %vm563_vm13 = vcmp.eq.s32.totalorder %v535_v46, %v2753_v57 }
 0x15c   : > { %vm1780_vm14 = vmpackc.low %vm564_vm12, %vm563_vm13  ;;  %vm1529_vm12 = vcmask 1043459   ;;  %vm1532_vm13 = vcmask 1044484  }
 0x15d   : > { %1956 = vmatprep.mubr.msk.bf16.mxu1 %vm1780_vm14, %v2434_v61  ;;  %vm1535_vm14 = vcmask 1045509  }
 0x15e   : > { %v976_v47 = vpop.permute.xlu1 %975  ;;  %v972_v48 = vpop.permute.xlu0 %971 }
 0x15f   : > { %vm1001_vm15 = vcmp.eq.s32.totalorder %v976_v47, %v2753_v57  ;;  %vm1000_vm0 = vcmp.eq.s32.totalorder %v972_v48, %v2753_v57 }
 0x160   : > { %vm1829_vm1 = vmpackc.low %vm1001_vm15, %vm1000_vm0  ;;  %vm1538_vm15 = vcmask 1046534   ;;  %vm1541_vm0 = vcmask 1047559  }
 0x161   : > { %2020 = vmatprep.mubr.msk.bf16.mxu0 %vm1829_vm1, %v2434_v61 }
 0x162   : > { %v550_v49 = vpop.permute.xlu1 %549  ;;  %v546_v50 = vpop.permute.xlu0 %545 }
 0x163   : > { %vm566_vm2 = vcmp.eq.s32.totalorder %v550_v49, %v2753_v57  ;;  %vm565_vm3 = vcmp.eq.s32.totalorder %v546_v50, %v2753_v57  ;;  %v2227_v49 = vld [vmem:[#allocation8] sm:$0xff]   ;;  %v2435_v50 = vmov 0.0  }
 0x164   : > { %vm1782_vm4 = vmpackc.low %vm566_vm2, %vm565_vm3  ;;  %2056 = vmatprep.subr.bf16.mxu1 %v2435_v50 }
 0x165   : > { %1957 = vmatmul.mubr.msk.bf16.gmra.mrb[12].mxu1 %vm1782_vm4, %v2434_v61 }
 0x166   : > { %v987_v51 = vpop.permute.xlu1 %986  ;;  %v983_v52 = vpop.permute.xlu0 %982 }
 0x167   : > { %vm1003_vm5 = vcmp.eq.s32.totalorder %v987_v51, %v2753_v57  ;;  %vm1002_vm6 = vcmp.eq.s32.totalorder %v983_v52, %v2753_v57  ;;  %v2228_v51 = vld [vmem:[#allocation8 + $0x8] sm:$0xff]   ;;  %v2229_v52 = vld [vmem:[#allocation8 + $0x10] sm:$0xff]  }
 0x168   : > { %vm1831_vm7 = vmpackc.low %vm1003_vm5, %vm1002_vm6 }
 0x169   : > { %2021 = vmatmul.mubr.msk.bf16.gmra.mrb[12].mxu0 %vm1831_vm7, %v2434_v61 }
 0x208   : > { %v1946_v56 = vpop.f32.mrb[0].mxu1 }
 0x209   : > { %v690_v58 = vpop.f32.mrb[1].mxu1 }
 0x20a   : > { %v1947_v59 = vpop.f32.mrb[2].mxu1 }
 0x20b   : > { %v693_v60 = vpop.f32.mrb[3].mxu1 }
 0x20c   : > { %v2010_v62 = vpop.f32.mrb[0].mxu0 }
 0x20d   : > { %v2076_v63 = vadd.f32 %v2010_v62, %v1946_v56  ;;  %v1127_v0 = vpop.f32.mrb[1].mxu0  ;;  %v2233_v56 = vld [vmem:[#allocation8 + $0x30] sm:$0xff]  }
 0x20e   : > { %v2077_v57 = vadd.f32 %v1127_v0, %v690_v58  ;;  %v2011_v2 = vpop.f32.mrb[2].mxu0  ;;  %v2234_v58 = vld [vmem:[#allocation8 + $0x38] sm:$0xff]  }
 0x20f   : > { %v2078_v3 = vadd.f32 %v2011_v2, %v1947_v59  ;;  %v1130_v61 = vpop.f32.mrb[3].mxu0  ;;  %v2830_v59 = vadd.s32 8, %v2683_v1 }
 0x210   : > { %v2079_v4 = vadd.f32 %v1130_v61, %v693_v60 }
 0x211   : > { %v1207_v5 = vpack.c.bf16 %v2078_v3, %v2076_v63  ;;  %vm1379_vm9 = vcmp.lt.s32.totalorder %v2830_v59, 14 }
 0x212   : > { %v1206_v6 = vpack.c.bf16 %v2079_v4, %v2077_v57 }
 0x214   : > { %2040 = vmatprep.mubr.bf16.mxu1 %v1206_v6 }
 0x215   : > { %2041 = vmatmul.mubr.bf16.vlgmr.msra.gmra.mrb[16].mxu1 %v1207_v5 }
 0x216   : > { %2057 = vmatpush3.bf16.msra.mxu1 %v2227_v49 }
 0x217   : > { %2058 = vmatprep.subr.bf16.mxu1 %v2435_v50 }
 0x218   : > { %v1950_v7 = vpop.f32.mrb[4].mxu1 }
 0x219   : > { %v706_v8 = vpop.f32.mrb[5].mxu1 }
 0x21a   : > { %v1951_v9 = vpop.f32.mrb[6].mxu1  ;;  %2059 = vmatpush3.bf16.msra.mxu1 %v2228_v51 }
 0x21b   : > { %v709_v10 = vpop.f32.mrb[7].mxu1  ;;  %2060 = vmatprep.subr.bf16.mxu1 %v2435_v50 }
 0x21c   : > { %v2014_v11 = vpop.f32.mrb[4].mxu0 }
 0x21d   : > { %v2080_v12 = vadd.f32 %v2014_v11, %v1950_v7  ;;  %v1143_v13 = vpop.f32.mrb[5].mxu0 }
 0x21e   : > { %v2081_v14 = vadd.f32 %v1143_v13, %v706_v8  ;;  %v2015_v15 = vpop.f32.mrb[6].mxu0  ;;  %2061 = vmatpush3.bf16.msra.mxu1 %v2229_v52 }
 0x21f   : > { %v2082_v16 = vadd.f32 %v2015_v15, %v1951_v9  ;;  %v1146_v17 = vpop.f32.mrb[7].mxu0  ;;  %2062 = vmatprep.subr.bf16.mxu1 %v2435_v50 }
 0x220   : > { %v2083_v18 = vadd.f32 %v1146_v17, %v709_v10 }
 0x221   : > { %v1209_v19 = vpack.c.bf16 %v2082_v16, %v2080_v12  ;;  %v2840_v12 = vld [vmem:[%s2917_s3] ss:$0 sm:$0xff] }
 0x222   : > { %v1208_v20 = vpack.c.bf16 %v2083_v18, %v2081_v14  ;;  %2063 = vmatpush3.bf16.msra.mxu1 %v2230_v53 }
 0x223   : > { %2064 = vmatprep.subr.bf16.mxu1 %v2435_v50 }
 0x224   : > { %2044 = vmatprep.mubr.bf16.mxu1 %v1208_v20 }
 0x225   : > { %2045 = vmatmul.mubr.bf16.gmra.mrb[20].mxu1 %v1209_v19 }
 0x226   : > { %2065 = vmatpush3.bf16.msra.mxu1 %v2231_v54 }
 0x227   : > { %2066 = vmatprep.subr.bf16.mxu1 %v2435_v50 }
 0x228   : > { %v1954_v21 = vpop.f32.mrb[8].mxu1 }
 0x229   : > { %v722_v22 = vpop.f32.mrb[9].mxu1 }
 0x22a   : > { %v1955_v23 = vpop.f32.mrb[10].mxu1  ;;  %2067 = vmatpush3.bf16.msra.mxu1 %v2232_v55 }
 0x22b   : > { %v725_v24 = vpop.f32.mrb[11].mxu1  ;;  %2068 = vmatprep.subr.bf16.mxu1 %v2435_v50 }
 0x22c   : > { %v2018_v25 = vpop.f32.mrb[8].mxu0 }
 0x22d   : > { %v2084_v26 = vadd.f32 %v2018_v25, %v1954_v21  ;;  %v1159_v27 = vpop.f32.mrb[9].mxu0 }
 0x22e   : > { %v2085_v28 = vadd.f32 %v1159_v27, %v722_v22  ;;  %v2019_v29 = vpop.f32.mrb[10].mxu0  ;;  %2069 = vmatpush3.bf16.msra.mxu1 %v2233_v56 }
 0x22f   : > { %v2086_v30 = vadd.f32 %v2019_v29, %v1955_v23  ;;  %v1162_v31 = vpop.f32.mrb[11].mxu0  ;;  %2070 = vmatprep.subr.bf16.mxu1 %v2435_v50 }
 0x230   : > { %v2087_v32 = vadd.f32 %v1162_v31, %v725_v24 }
 0x231   : > { %v1211_v33 = vpack.c.bf16 %v2086_v30, %v2084_v26 }
 0x232   : > { %v1210_v34 = vpack.c.bf16 %v2087_v32, %v2085_v28  ;;  %2071 = vmatpush3.bf16.msra.mxu1 %v2234_v58 }
 0x234   : > { %2048 = vmatprep.mubr.bf16.mxu1 %v1210_v34 }
 0x235   : > { %2049 = vmatmul.mubr.bf16.gmra.mrb[24].mxu1 %v1211_v33 }
 0x238   : > { %v1958_v35 = vpop.f32.mrb[12].mxu1 }
 0x239   : > { %v738_v36 = vpop.f32.mrb[13].mxu1 }
 0x23a   : > { %v1959_v37 = vpop.f32.mrb[14].mxu1 }
 0x23b   : > { %v741_v38 = vpop.f32.mrb[15].mxu1 }
 0x23c   : > { %v2022_v39 = vpop.f32.mrb[12].mxu0 }
 0x23d   : > { %v2088_v40 = vadd.f32 %v2022_v39, %v1958_v35  ;;  %v1175_v41 = vpop.f32.mrb[13].mxu0 }
 0x23e   : > { %v2089_v42 = vadd.f32 %v1175_v41, %v738_v36  ;;  %v2023_v43 = vpop.f32.mrb[14].mxu0 }
 0x23f   : > { %v2090_v44 = vadd.f32 %v2023_v43, %v1959_v37  ;;  %v1178_v45 = vpop.f32.mrb[15].mxu0 }
 0x240   : > { %v2091_v46 = vadd.f32 %v1178_v45, %v741_v38 }
 0x241   : > { %v1213_v47 = vpack.c.bf16 %v2090_v44, %v2088_v40 }
 0x242   : > { %v1212_v48 = vpack.c.bf16 %v2091_v46, %v2089_v42 }
 0x244   : > { %2052 = vmatprep.mubr.bf16.mxu1 %v1212_v48 }
 0x245   : > { %2053 = vmatmul.mubr.bf16.gmra.mrb[28].mxu1 %v1213_v47 }
 0x246   : > { %2072 = vmatprep.mubr.msk.bf16.mxu1 %vm2436_vm8, %v2435_v50 }
 0x2e8   : > { %v2042_v60 = vpop.f32.mrb[16].mxu1 }
 0x2e9   : > { %v1312_v62 = vpop.f32.mrb[17].mxu1 }
 0x2ea   : > { %v2043_v63 = vpop.f32.mrb[18].mxu1 }
 0x2eb   : > { %v1383_v0 = vsel %vm1379_vm9, %v2043_v63, -inf  ;;  %v1315_v57 = vpop.f32.mrb[19].mxu1 }
 0x2ec   : > { %v1403_v2 = vmax.f32 %v2042_v60, %v1383_v0  ;;  %v1381_v3 = vsel %vm1379_vm9, %v1315_v57, -inf }
 0x2ed   : > { %v1396_v61 = vmax.f32 %v1312_v62, %v1381_v3 }
 0x2ee   : > { %v1404_v4 = vrot.slane %v1403_v2, 4 }
 0x2ef   : > { %v1397_v5 = vrot.slane %v1396_v61, 4 }
 0x2f0   : > { %v1405_v6 = vmax.f32 %v1403_v2, %v1404_v4 }
 0x2f1   : > { %v1398_v7 = vmax.f32 %v1396_v61, %v1397_v5 }
 0x2f2   : > { %v1406_v1 = vrot.slane %v1405_v6, 2 }
 0x2f3   : > { %v1399_v8 = vrot.slane %v1398_v7, 2 }
 0x2f4   : > { %v1407_v9 = vmax.f32 %v1405_v6, %v1406_v1 }
 0x2f5   : > { %v1400_v10 = vmax.f32 %v1398_v7, %v1399_v8 }
 0x2f6   : > { %v1408_v11 = vrot.slane %v1407_v9, 1 }
 0x2f7   : > { %v1401_v13 = vrot.slane %v1400_v10, 1 }
 0x2f8   : > { %v1409_v14 = vmax.f32 %v1407_v9, %v1408_v11  ;;  %v2046_v15 = vpop.f32.mrb[20].mxu1 }
 0x2f9   : > { %v1402_v16 = vmax.f32 %v1400_v10, %v1401_v13  ;;  %v1328_v17 = vpop.f32.mrb[21].mxu1 }
 0x2fa   : > { %v1460_v18 = vadd.f32 %v2840_v12, %v1409_v14  ;;  %v2047_v19 = vpop.f32.mrb[22].mxu1 }
 0x2fb   : > { %v1459_v20 = vadd.f32 %v2840_v12, %v1402_v16  ;;  %v1387_v21 = vsel %vm1379_vm9, %v2047_v19, -inf  ;;  %v1331_v22 = vpop.f32.mrb[23].mxu1 }
 0x2fc   : > { %v1468_v23 = vmax.f32 %v1460_v18, 0.0  ;;  %v1417_v24 = vmax.f32 %v2046_v15, %v1387_v21  ;;  %v1385_v25 = vsel %vm1379_vm9, %v1331_v22, -inf }
 0x2fd   : > { %v1467_v26 = vmax.f32 %v1459_v20, 0.0  ;;  %v1410_v27 = vmax.f32 %v1328_v17, %v1385_v25 }
 0x2fe   : > { %v1476_v28 = vpack.c.bf16 %v1468_v23, %v1468_v23  ;;  %v1418_v29 = vrot.slane %v1417_v24, 4 }
 0x2ff   : > { %v1475_v30 = vpack.c.bf16 %v1467_v26, %v1467_v26  ;;  %v1411_v31 = vrot.slane %v1410_v27, 4 }
 0x300   : > { %v1515_v32 = vunpack.c.l.b16 %v1476_v28  ;;  %v1419_v33 = vmax.f32 %v1417_v24, %v1418_v29 }
 0x301   : > { %v1514_v34 = vunpack.c.l.b16 %v1475_v30  ;;  %v1412_v35 = vmax.f32 %v1410_v27, %v1411_v31 }
 0x302   : > { %v1522_v36 = vrot.slane %v1515_v32, 7  ;;  %v1420_v37 = vrot.slane %v1419_v33, 2 }
 0x303   : > { %v1413_v38 = vrot.slane %v1412_v35, 2 }
 0x304   : > { %v1524_v39 = vsel %vm1523_vm10, %v1522_v36, %v1514_v34  ;;  %v1421_v40 = vmax.f32 %v1419_v33, %v1420_v37 }
 0x305   : > { %v1414_v41 = vmax.f32 %v1412_v35, %v1413_v38 }
 0x306   : > { %v1422_v42 = vrot.slane %v1421_v40, 1 }
 0x307   : > { %v1415_v43 = vrot.slane %v1414_v41, 1 }
 0x308   : > { %v1423_v44 = vmax.f32 %v1421_v40, %v1422_v42  ;;  %v2050_v45 = vpop.f32.mrb[24].mxu1 }
 0x309   : > { %v1416_v46 = vmax.f32 %v1414_v41, %v1415_v43  ;;  %v1344_v47 = vpop.f32.mrb[25].mxu1 }
 0x30a   : > { %v1462_v48 = vadd.f32 %v2840_v12, %v1423_v44  ;;  %v2051_v49 = vpop.f32.mrb[26].mxu1 }
 0x30b   : > { %v1461_v50 = vadd.f32 %v2840_v12, %v1416_v46  ;;  %v1391_v51 = vsel %vm1379_vm9, %v2051_v49, -inf  ;;  %v1347_v52 = vpop.f32.mrb[27].mxu1 }
 0x30c   : > { %v1470_v53 = vmax.f32 %v1462_v48, 0.0  ;;  %v1431_v54 = vmax.f32 %v2050_v45, %v1391_v51  ;;  %v1389_v55 = vsel %vm1379_vm9, %v1347_v52, -inf }
 0x30d   : > { %v1469_v56 = vmax.f32 %v1461_v50, 0.0  ;;  %v1424_v58 = vmax.f32 %v1344_v47, %v1389_v55 }
 0x30e   : > { %v1478_v60 = vpack.c.bf16 %v1470_v53, %v1470_v53  ;;  %v1432_v62 = vrot.slane %v1431_v54, 4 }
 0x30f   : > { %v1477_v63 = vpack.c.bf16 %v1469_v56, %v1469_v56  ;;  %v1425_v0 = vrot.slane %v1424_v58, 4 }
 0x310   : > { %v1517_v57 = vunpack.c.l.b16 %v1478_v60  ;;  %v1433_v2 = vmax.f32 %v1431_v54, %v1432_v62 }
 0x311   : > { %v1516_v3 = vunpack.c.l.b16 %v1477_v63  ;;  %v1426_v61 = vmax.f32 %v1424_v58, %v1425_v0 }
 0x312   : > { %v1434_v4 = vrot.slane %v1433_v2, 2  ;;  %v1528_v7 = vrot.slane %v1517_v57, 5 }
 0x313   : > { %v1525_v5 = vrot.slane %v1516_v3, 6  ;;  %v1427_v6 = vrot.slane %v1426_v61, 2 }
 0x314   : > { %v1435_v1 = vmax.f32 %v1433_v2, %v1434_v4 }
 0x315   : > { %v1527_v8 = vsel %vm1526_vm11, %v1525_v5, %v1524_v39  ;;  %v1428_v9 = vmax.f32 %v1426_v61, %v1427_v6 }
 0x316   : > { %v1436_v10 = vrot.slane %v1435_v1, 1  ;;  %v1530_v11 = vsel %vm1529_vm12, %v1528_v7, %v1527_v8 }
 0x317   : > { %v1429_v13 = vrot.slane %v1428_v9, 1 }
 0x318   : > { %v1437_v14 = vmax.f32 %v1435_v1, %v1436_v10  ;;  %v2054_v15 = vpop.f32.mrb[28].mxu1 }
 0x319   : > { %v1430_v16 = vmax.f32 %v1428_v9, %v1429_v13  ;;  %v1360_v17 = vpop.f32.mrb[29].mxu1 }
 0x31a   : > { %v1464_v18 = vadd.f32 %v2840_v12, %v1437_v14  ;;  %v2055_v19 = vpop.f32.mrb[30].mxu1 }
 0x31b   : > { %v1463_v20 = vadd.f32 %v2840_v12, %v1430_v16  ;;  %v1395_v21 = vsel %vm1379_vm9, %v2055_v19, -inf  ;;  %v1363_v22 = vpop.f32.mrb[31].mxu1 }
 0x31c   : > { %v1472_v23 = vmax.f32 %v1464_v18, 0.0  ;;  %v1445_v24 = vmax.f32 %v2054_v15, %v1395_v21  ;;  %v1393_v25 = vsel %vm1379_vm9, %v1363_v22, -inf }
 0x31d   : > { %v1471_v26 = vmax.f32 %v1463_v20, 0.0  ;;  %v1438_v27 = vmax.f32 %v1360_v17, %v1393_v25 }
 0x31e   : > { %v1480_v28 = vpack.c.bf16 %v1472_v23, %v1472_v23  ;;  %v1446_v29 = vrot.slane %v1445_v24, 4 }
 0x31f   : > { %v1479_v30 = vpack.c.bf16 %v1471_v26, %v1471_v26  ;;  %v1439_v31 = vrot.slane %v1438_v27, 4 }
 0x320   : > { %v1519_v32 = vunpack.c.l.b16 %v1480_v28  ;;  %v1447_v33 = vmax.f32 %v1445_v24, %v1446_v29 }
 0x321   : > { %v1518_v34 = vunpack.c.l.b16 %v1479_v30  ;;  %v1440_v35 = vmax.f32 %v1438_v27, %v1439_v31 }
 0x322   : > { %v1448_v36 = vrot.slane %v1447_v33, 2  ;;  %v1534_v39 = vrot.slane %v1519_v32, 3 }
 0x323   : > { %v1531_v37 = vrot.slane %v1518_v34, 4  ;;  %v1441_v38 = vrot.slane %v1440_v35, 2 }
 0x324   : > { %v1449_v40 = vmax.f32 %v1447_v33, %v1448_v36 }
 0x325   : > { %v1533_v41 = vsel %vm1532_vm13, %v1531_v37, %v1530_v11  ;;  %v1442_v59 = vmax.f32 %v1440_v35, %v1441_v38 }
 0x326   : > { %v1450_v42 = vrot.slane %v1449_v40, 1  ;;  %v1536_v43 = vsel %vm1535_vm14, %v1534_v39, %v1533_v41 }
 0x327   : > { %v1443_v44 = vrot.slane %v1442_v59, 1 }
 0x328   : > { %v1451_v45 = vmax.f32 %v1449_v40, %v1450_v42 }
 0x329   : > { %v1444_v46 = vmax.f32 %v1442_v59, %v1443_v44 }
 0x32a   : > { %v1466_v47 = vadd.f32 %v2840_v12, %v1451_v45 }
 0x32b   : > { %v1465_v48 = vadd.f32 %v2840_v12, %v1444_v46  ;;  %v1842_v12 = vld [vmem:[%s2919_s5] ss:$0 sm:$0xff] }
 0x32c   : > { %v1474_v49 = vmax.f32 %v1466_v47, 0.0 }
 0x32d   : > { %v1473_v50 = vmax.f32 %v1465_v48, 0.0 }
 0x32e   : > { %v1482_v51 = vpack.c.bf16 %v1474_v49, %v1474_v49 }
 0x32f   : > { %v1481_v52 = vpack.c.bf16 %v1473_v50, %v1473_v50 }
 0x330   : > { %v1521_v53 = vunpack.c.l.b16 %v1482_v51 }
 0x331   : > { %v1520_v54 = vunpack.c.l.b16 %v1481_v52 }
 0x332   : > { %v1540_v56 = vrot.slane %v1521_v53, 1 }
 0x333   : > { %v1537_v55 = vrot.slane %v1520_v54, 2 }
 0x335   : > { %v1539_v58 = vsel %vm1538_vm15, %v1537_v55, %v1536_v43 }
 0x336   : > { %v1542_v60 = vsel %vm1541_vm0, %v1540_v56, %v1539_v58 }
 0x337   : > { %v1543_v62 = vpack.c.b16 %v1542_v60, %v1542_v60 }
 0x339   : > { %2073 = vmatmul.mubr.bf16.vlgmr.msra.gmra.mrb[32].mxu1 %v1543_v62 }
 0x40c   : > { %v1627_v63 = vpop.f32.mrb[32].mxu1 }
 0x40d   : > { %v1628_v0 = vadd.f32 %v1842_v12, %v1627_v63  ;;  %v2074_v57 = vpop.f32.mrb[33].mxu1 }
 0x40e   : > { %v1630_v2 = vpop.f32.mrb[34].mxu1 }
 0x40f   : > { %1633 = vst [vmem:[%s312_s16] sm:$0xff] %v1628_v0  ;;  %v2075_v3 = vpop.f32.mrb[35].mxu1 }
 0x410   : > { %2362 = shalt.err (!%p2359_p12)
}
 0x411   : > { %s2363_s27 = scalar_lea.hbm %s2870_s28, 128  ;;  %s2367_s29 = scalar_lea.hbm %s2920_s6, 256 }
 0x412   : > { %p2364_p3 = scmp.ne.s32.totalorder %s2870_s28, %s2363_s27  ;;  %p2368_p13 = scmp.lt.u32.totalorder %s2870_s28, %s2920_s6 }
 0x413   : > { %p2369_p7 = scmp.lt.u32.totalorder %s2367_s29, %s2363_s27  ;;  %p2371_p10 = scmp.lt.u32.totalorder %s2363_s27, %s2870_s28 }
 0x414   : > { %p2365_p6 = pnand %p2364_p3, %p2951_p1 }
 0x415   : > { %p2370_p9 = por %p2369_p7, %p2368_p13 }
 0x416   : > { %p2366_p2 = pneg %p2365_p6 }
 0x417   : > { %p2372_p4 = por %p2371_p10, %p2370_p9 }
 0x419   : > { %p2373_p0 = pnand %p2372_p4, %p2366_p2 }
 0x41b   : > { %2376 = shalt.err (!%p2373_p0)
}
 0x41c   : > { %2124 = dma.vmem_to_hbm [thread:$0]  (%p2951_p1), %s2872_s1, 128, %s2870_s28, %s1635_s30  }
 0x41d PF: > { %s2952_s26 = sld [smem:[#allocation17_spill]]  ;;  %s1660_s19 = sand.u32 1, %s2411_s21  }
 0x41e   : > { %p2954_p5 = scmp.ge.s32.totalorder %s2423_s24, 2  ;;  %s1661_s13 = scalar_lea.sflag [#allocation4], %s1660_s19 }
 0x423   : > { %p2953_p8 = scmp.ne.s32.totalorder %s2952_s26, 0 }
 0x425   : > { %p2141_p11 = pnand %p2954_p5, %p2953_p8 }
 0x427   : > { %2406 = dma.done.wait (!%p2141_p11), %s1661_s13, 128  }
 0x428   : > { %2408 = vsyncadd (!%p2141_p11), %s1661_s13, 4294967168  ;;  %s2955_s24 = sld [smem:[#allocation15_spill]]  ;;  %s2956_s7 = sld [smem:[#allocation16_spill]] }
 0x429   : > { %s2957_s21 = smov %s2415_s22  ;;  %s2958_s22 = smov %s2419_s23 }
 0x42e   : > { %p21_p12 = scmp.ge.s32.totalorder %s2955_s24, 4   ;;  %s2959_s23 = smov %s2956_s7 }
 0x430   :  { %23 = sbr.rel (!%p21_p12) target bundleno = 9 (0x9), region = 105 }
 0x437   :  { %1666 = vsyncpa [#allocation3], 1 }
 0x438   :  { %1668 = vsyncpa [#allocation3 + $0x1], 1 }
 0x439   :  { %1669 = vsyncpa [#allocation6], 1 }
 0x43a   :  { %1670 = vsyncpa [#allocation9], 1 }
 0x43b   :  { %1671 = vsyncpa [#allocation4], 1 }
 0x43c   :  { %1673 = vsyncpa [#allocation4 + $0x1], 1 }

</bundles_post_ra>
